<compile_context>
chip_gen: v7x
topology: tpu7x:2x2x1
jax: 0.10.0
libtpu: 0.0.40
codegen_flags: <defaults>
</compile_context>

<pallas_src>
import jax
import jax.numpy as jnp
import numpy as np
from jax.experimental import pallas as pl
from jax.experimental.pallas import tpu as pltpu


# ----------------------------------------------------------------------------
# Fused Conv3x3(pad=1) + BatchNorm + ReLU + MaxPool2d((tp, fp)) kernel.
# ----------------------------------------------------------------------------
def conv_bn_relu_pool_kernel(xs_ref, t_ref, scale_ref, shift_ref, out_ref):
    # xs_ref   : (tp, B, Hp//tp, Wp*Cin)  padded input, rows split by H-parity,
    #            (W, Cin) merged into lanes (done in XLA glue).
    # t_ref    : (3, Wp*Cin, fp*Wo*Cout)  banded conv weights per kh tap, bf16.
    # scale_ref, shift_ref : (1, fp*Wo*Cout)  folded conv-bias + BN, tiled.
    # out_ref  : (B*Ho, Wo*Cout)          pooled, lane-dense output.
    tp, B, _, L = xs_ref.shape
    M, NC = out_ref.shape                 # M = B*Ho, NC = Wo*Cout
    Ho = M // B
    ncols = t_ref.shape[2]                # fp*Wo*Cout
    fp = ncols // NC

    pooled = None
    for i in range(tp):                   # output-row parity (time-pool group)
        acc = jnp.zeros((M, ncols), jnp.float32)
        for kh in range(3):               # 3 taps along H, one matmul each
            p = (i + kh) % tp
            q0 = (i + kh) // tp
            slab = xs_ref[p, :, q0:q0 + Ho, :].reshape(M, L)
            acc = acc + jnp.dot(slab.astype(jnp.bfloat16), t_ref[kh],
                                preferred_element_type=jnp.float32)
        act = jnp.maximum(acc * scale_ref[...] + shift_ref[...], 0.0)
        # freq (W) pooling: max over the fp lane-chunks.
        pw = act[:, 0:NC]
        for j in range(1, fp):
            pw = jnp.maximum(pw, act[:, j * NC:(j + 1) * NC])
        # time (H) pooling: max over the tp row-parity groups.
        pooled = pw if pooled is None else jnp.maximum(pooled, pw)
    out_ref[...] = pooled.astype(out_ref.dtype)


def conv_block_pool(x, w, b, gamma, beta, mean, var, tp, fp, eps=1e-5):
    # x: (B, H, W, Cin) channels-last.  w: (Cout, Cin, 3, 3) (torch layout).
    B, H, W, Cin = x.shape
    Cout = w.shape[0]
    assert H % tp == 0 and W % fp == 0 and (H + 2) % tp == 0
    Ho, Wo = H // tp, W // fp
    Hp, Wp = H + 2, W + 2

    # --- input prep (XLA glue): pad, merge (W, Cin) into lanes, split H parity
    xp = jnp.pad(x.astype(jnp.float32), ((0, 0), (1, 1), (1, 1), (0, 0)))
    xpm = xp.reshape(B, Hp, Wp * Cin)
    xs = jnp.stack([xpm[:, p::tp, :] for p in range(tp)], axis=0)

    # --- banded (Toeplitz) conv weights: one (Wp*Cin, fp*Wo*Cout) matrix / kh.
    ind = np.zeros((3, Wp, fp, Wo), np.float32)
    for kw in range(3):
        for j in range(fp):
            for wo in range(Wo):
                ind[kw, fp * wo + j + kw, j, wo] = 1.0
    w_r = jnp.transpose(w, (2, 3, 1, 0))                    # (kh, kw, Cin, Cout)
    t = jnp.einsum('kpjw,hkio->hpijwo', jnp.asarray(ind), w_r)
    t = t.reshape(3, Wp * Cin, fp * Wo * Cout).astype(jnp.bfloat16)

    # --- fold conv bias + BN (eval) into scale/shift, tiled over (j, wo).
    scale = (gamma / jnp.sqrt(var + eps)).astype(jnp.float32)
    shift = ((b - mean) * scale + beta).astype(jnp.float32)
    scale_t = jnp.tile(scale, fp * Wo).reshape(1, fp * Wo * Cout)
    shift_t = jnp.tile(shift, fp * Wo).reshape(1, fp * Wo * Cout)

    out = pl.pallas_call(
        conv_bn_relu_pool_kernel,
        out_shape=jax.ShapeDtypeStruct((B * Ho, Wo * Cout), jnp.float32),
        compiler_params=pltpu.CompilerParams(
            vmem_limit_bytes=32 * 1024 * 1024),
    )(xs, t, scale_t, shift_t)
    return out.reshape(B, Ho, Wo, Cout)


# ----------------------------------------------------------------------------
# Hoisted GRU input projection: one matmul for both directions, whole sequence.
# ----------------------------------------------------------------------------
def matmul_bias_kernel(x_ref, w_ref, b_ref, o_ref):
    o_ref[...] = (jnp.dot(x_ref[...], w_ref[...],
                          preferred_element_type=jnp.float32)
                  + b_ref[...]).astype(o_ref.dtype)


# ----------------------------------------------------------------------------
# Bidirectional GRU recurrence (both directions per grid step) + fused head
# (tanh gate, FNN layers, final tanh) executed at the last grid step.
# ----------------------------------------------------------------------------
def gru_bidir_head_kernel(gf_ref, gb_ref, whf_ref, whb_ref, bhf_ref, bhb_ref,
                          w1_ref, b1_ref, w2_ref, b2_ref,
                          out_ref, hf_ref, hb_ref, hfa_ref, hba_ref):
    t = pl.program_id(0)
    nt = pl.num_programs(0)
    B, H = hf_ref.shape

    @pl.when(t == 0)
    def _():
        hf_ref[...] = jnp.zeros_like(hf_ref)
        hb_ref[...] = jnp.zeros_like(hb_ref)

    def sigmoid(a):
        return pl.reciprocal(1.0 + jnp.exp(-a), approx=True)

    def gru_step(gi, h, wh_ref, bh_ref):
        # gi = x @ Wi^T + bi (precomputed);  hh = h @ Wh^T + bh (one matmul).
        hh = jnp.dot(h, wh_ref[...], preferred_element_type=jnp.float32) \
            + bh_ref[...]
        r = sigmoid(gi[:, 0 * H:1 * H] + hh[:, 0 * H:1 * H])
        z = sigmoid(gi[:, 1 * H:2 * H] + hh[:, 1 * H:2 * H])
        n = jnp.tanh(gi[:, 2 * H:3 * H] + r * hh[:, 2 * H:3 * H])
        return (1.0 - z) * n + z * h

    hf_new = gru_step(gf_ref[0], hf_ref[...], whf_ref, bhf_ref)
    hb_new = gru_step(gb_ref[0], hb_ref[...], whb_ref, bhb_ref)
    hf_ref[...] = hf_new
    hb_ref[...] = hb_new
    hfa_ref[t] = hf_new                 # forward output at time t
    hba_ref[nt - 1 - t] = hb_new        # backward output at time nt-1-t

    @pl.when(t == nt - 1)
    def _():
        nb = out_ref.shape[0]
        for bi in range(nb):            # small static batch loop
            gb = jnp.tanh(hba_ref[:, bi, :]) * jnp.tanh(hfa_ref[:, bi, :])
            h1 = jnp.dot(gb, w1_ref[...],
                         preferred_element_type=jnp.float32) + b1_ref[...]
            ob = jnp.tanh(jnp.dot(h1, w2_ref[...],
                                  preferred_element_type=jnp.float32)
                          + b2_ref[...])
            out_ref[bi] = ob.astype(out_ref.dtype)


def gru_bidir_head(gates_f, gates_b, wh_f, wh_b, bh_f, bh_b,
                   w1, b1, w2, b2, out_dim):
    T, B, threeH = gates_f.shape
    H = threeH // 3
    F = w1.shape[1]
    return pl.pallas_call(
        gru_bidir_head_kernel,
        out_shape=jax.ShapeDtypeStruct((B, T, out_dim), jnp.float32),
        grid=(T,),
        in_specs=[
            pl.BlockSpec((1, B, 3 * H), lambda t: (t, 0, 0)),
            pl.BlockSpec((1, B, 3 * H), lambda t: (T - 1 - t, 0, 0)),
            pl.BlockSpec((H, 3 * H), lambda t: (0, 0)),
            pl.BlockSpec((H, 3 * H), lambda t: (0, 0)),
            pl.BlockSpec((1, 3 * H), lambda t: (0, 0)),
            pl.BlockSpec((1, 3 * H), lambda t: (0, 0)),
            pl.BlockSpec((H, F), lambda t: (0, 0)),
            pl.BlockSpec((1, F), lambda t: (0, 0)),
            pl.BlockSpec((F, out_dim), lambda t: (0, 0)),
            pl.BlockSpec((1, out_dim), lambda t: (0, 0)),
        ],
        out_specs=pl.BlockSpec((B, T, out_dim), lambda t: (0, 0, 0)),
        scratch_shapes=[
            pltpu.VMEM((B, H), jnp.float32),      # forward state
            pltpu.VMEM((B, H), jnp.float32),      # backward state
            pltpu.VMEM((T, B, H), jnp.float32),   # all forward outputs
            pltpu.VMEM((T, B, H), jnp.float32),   # all backward outputs
        ],
        compiler_params=pltpu.CompilerParams(
            dimension_semantics=("arbitrary",),   # sequential recurrence
            vmem_limit_bytes=32 * 1024 * 1024),
    )(gates_f, gates_b, wh_f, wh_b, bh_f, bh_b, w1, b1, w2, b2)


# ----------------------------------------------------------------------------
# Deterministic synthetic parameters and the full forward pass.
# ----------------------------------------------------------------------------
def init_weights(key, in_channels, in_freq, params, out_dim):
    keys = iter(jax.random.split(key, 64))

    def nrm(shape, scale):
        return (scale * jax.random.normal(next(keys), shape)).astype(jnp.float32)

    conv = []
    cin = in_channels
    for _ in range(len(params['f_pool_size'])):
        cout = params['nb_cnn2d_filt']
        conv.append(dict(
            w=nrm((cout, cin, 3, 3), 0.3 / (cin ** 0.5)),
            b=nrm((cout,), 0.05),
            gamma=1.0 + nrm((cout,), 0.05),
            beta=nrm((cout,), 0.05),
            mean=nrm((cout,), 0.05),
            var=1.0 + jnp.abs(nrm((cout,), 0.05)),
        ))
        cin = cout

    H = params['rnn_size']
    in_gru = params['nb_cnn2d_filt'] * int(
        np.floor(in_freq / np.prod(params['f_pool_size'])))
    s = 1.0 / (H ** 0.5)
    gru = dict(
        wi_f=nrm((3 * H, in_gru), s), wh_f=nrm((3 * H, H), s),
        bi_f=nrm((3 * H,), s), bh_f=nrm((3 * H,), s),
        wi_b=nrm((3 * H, in_gru), s), wh_b=nrm((3 * H, H), s),
        bi_b=nrm((3 * H,), s), bh_b=nrm((3 * H,), s),
    )

    F = params['fnn_size']
    fnn = dict(
        w1=nrm((F, H), 1.0 / (H ** 0.5)), b1=nrm((F,), 0.05),
        w2=nrm((out_dim, F), 1.0 / (F ** 0.5)), b2=nrm((out_dim,), 0.05),
    )
    return dict(conv=conv, gru=gru, fnn=fnn)


def crnn_forward(x_nchw, params, wts):
    # NCHW (B, C, T, F) -> channels-last (B, T, F, C)
    x = jnp.transpose(x_nchw, (0, 2, 3, 1)).astype(jnp.float32)

    for i, cp in enumerate(wts['conv']):
        x = conv_block_pool(x, cp['w'], cp['b'], cp['gamma'], cp['beta'],
                            cp['mean'], cp['var'],
                            params['t_pool_size'][i], params['f_pool_size'][i])
        # Dropout2d: identity at inference.

    B, T, Fo, C = x.shape
    # torch: x.transpose(1, 2).view(B, T, C*F)  -> channels-major features
    feat = jnp.transpose(x, (0, 1, 3, 2)).reshape(B, T, C * Fo)
    x_tb = jnp.transpose(feat, (1, 0, 2))                    # (T, B, D)
    D = C * Fo
    H = params['rnn_size']
    g = wts['gru']

    # Hoisted GRU input projection for BOTH directions: one (T*B, D)x(D, 6H).
    wi_all = jnp.concatenate([g['wi_f'].T, g['wi_b'].T],
                             axis=1).astype(jnp.bfloat16)   # (D, 6H)
    bi_all = jnp.concatenate([g['bi_f'], g['bi_b']]).reshape(1, 6 * H)
    gates = pl.pallas_call(
        matmul_bias_kernel,
        out_shape=jax.ShapeDtypeStruct((T * B, 6 * H), jnp.float32),
        compiler_params=pltpu.CompilerParams(
            vmem_limit_bytes=32 * 1024 * 1024),
    )(x_tb.reshape(T * B, D).astype(jnp.bfloat16), wi_all,
      bi_all.astype(jnp.float32))
    gates = gates.reshape(T, B, 6 * H)
    gates_f = gates[:, :, :3 * H]
    gates_b = gates[:, :, 3 * H:]

    f = wts['fnn']
    out_dim = f['w2'].shape[0]
    doa = gru_bidir_head(
        gates_f, gates_b,
        g['wh_f'].T, g['wh_b'].T,
        g['bh_f'].reshape(1, 3 * H), g['bh_b'].reshape(1, 3 * H),
        f['w1'].T, f['b1'].reshape(1, -1),
        f['w2'].T, f['b2'].reshape(1, -1),
        out_dim)
    return doa                                               # (B, T, out_dim)


if __name__ == "__main__":
    params = dict(
        nb_cnn2d_filt=8,
        f_pool_size=[2, 2],
        t_pool_size=[1, 2],
        dropout_rate=0.05,
        nb_rnn_layers=1,
        rnn_size=16,
        nb_fnn_layers=1,
        fnn_size=16,
    )
    in_feat_shape = (2, 4, 16, 16)   # (B, C_in, T, F)
    out_dim = 3
    T_out = in_feat_shape[2] // int(np.prod(params['t_pool_size']))
    expected_out_shape = (in_feat_shape[0], T_out, out_dim)

    key = jax.random.PRNGKey(0)
    k_x, k_w = jax.random.split(key)
    x = jax.random.normal(k_x, in_feat_shape, dtype=jnp.float32)
    wts = init_weights(k_w, in_feat_shape[1], in_feat_shape[3], params, out_dim)

    fwd = jax.jit(lambda xx, ww: crnn_forward(xx, params, ww))
    doa = fwd(x, wts)
    doa = jax.block_until_ready(doa)

    assert doa.shape == expected_out_shape, (doa.shape, expected_out_shape)
    assert bool(jnp.all(jnp.isfinite(doa)))
    assert bool(jnp.all(jnp.abs(doa) <= 1.0))   # final tanh bound
    print("KERNEL_OK")
</pallas_src>

<mosaic_0001>
module attributes {stable_mosaic.version = 11 : i64} {
  func.func @conv_bn_relu_pool_kernel(%arg0: memref<1x2x18x72xf32, #tpu.memory_space<vmem>>, %arg1: memref<3x72x128xbf16, #tpu.memory_space<vmem>>, %arg2: memref<1x128xf32, #tpu.memory_space<vmem>>, %arg3: memref<1x128xf32, #tpu.memory_space<vmem>>, %arg4: memref<32x64xf32, #tpu.memory_space<vmem>>) attributes {dimension_semantics = [], scalar_prefetch = 0 : i64, scratch_operands = 0 : i64, tpu.core_type = #tpu.core_type<tc>} {
    %cst = arith.constant 0.000000e+00 : f32
    %0 = vector.broadcast %cst : f32 to vector<32x128xf32>
    %c0 = arith.constant 0 : index
    %c0_0 = arith.constant 0 : index
    %c0_1 = arith.constant 0 : index
    %c0_2 = arith.constant 0 : index
    %1 = vector.load %arg0[%c0, %c0_0, %c0_1, %c0_2] : memref<1x2x18x72xf32, #tpu.memory_space<vmem>>, vector<1x2x16x72xf32>
    %2 = vector.shape_cast %1 : vector<1x2x16x72xf32> to vector<2x16x72xf32>
    %3 = vector.shape_cast %2 : vector<2x16x72xf32> to vector<32x72xf32>
    %4 = arith.truncf %3 : vector<32x72xf32> to vector<32x72xbf16>
    %c0_3 = arith.constant 0 : index
    %c0_4 = arith.constant 0 : index
    %c0_5 = arith.constant 0 : index
    %5 = vector.load %arg1[%c0_3, %c0_4, %c0_5] : memref<3x72x128xbf16, #tpu.memory_space<vmem>>, vector<1x72x128xbf16>
    %6 = vector.shape_cast %5 : vector<1x72x128xbf16> to vector<72x128xbf16>
    %cst_6 = arith.constant dense<0.000000e+00> : vector<32x128xf32>
    %7 = tpu.matmul %4, %6, %cst_6 {dimension_numbers = #tpu.dot_dimension_numbers<[1], [0], [0], [1], [0, 0, 1, 1], [], []>} : vector<32x72xbf16>, vector<72x128xbf16>, vector<32x128xf32> -> vector<32x128xf32>
    %8 = arith.addf %0, %7 : vector<32x128xf32>
    %c0_7 = arith.constant 0 : index
    %c0_8 = arith.constant 0 : index
    %c1 = arith.constant 1 : index
    %c0_9 = arith.constant 0 : index
    %9 = vector.load %arg0[%c0_7, %c0_8, %c1, %c0_9] : memref<1x2x18x72xf32, #tpu.memory_space<vmem>>, vector<1x2x16x72xf32>
    %10 = vector.shape_cast %9 : vector<1x2x16x72xf32> to vector<2x16x72xf32>
    %11 = vector.shape_cast %10 : vector<2x16x72xf32> to vector<32x72xf32>
    %12 = arith.truncf %11 : vector<32x72xf32> to vector<32x72xbf16>
    %c1_10 = arith.constant 1 : index
    %c0_11 = arith.constant 0 : index
    %c0_12 = arith.constant 0 : index
    %13 = vector.load %arg1[%c1_10, %c0_11, %c0_12] : memref<3x72x128xbf16, #tpu.memory_space<vmem>>, vector<1x72x128xbf16>
    %14 = vector.shape_cast %13 : vector<1x72x128xbf16> to vector<72x128xbf16>
    %cst_13 = arith.constant dense<0.000000e+00> : vector<32x128xf32>
    %15 = tpu.matmul %12, %14, %cst_13 {dimension_numbers = #tpu.dot_dimension_numbers<[1], [0], [0], [1], [0, 0, 1, 1], [], []>} : vector<32x72xbf16>, vector<72x128xbf16>, vector<32x128xf32> -> vector<32x128xf32>
    %16 = arith.addf %8, %15 : vector<32x128xf32>
    %c0_14 = arith.constant 0 : index
    %c0_15 = arith.constant 0 : index
    %c2 = arith.constant 2 : index
    %c0_16 = arith.constant 0 : index
    %17 = vector.load %arg0[%c0_14, %c0_15, %c2, %c0_16] : memref<1x2x18x72xf32, #tpu.memory_space<vmem>>, vector<1x2x16x72xf32>
    %18 = vector.shape_cast %17 : vector<1x2x16x72xf32> to vector<2x16x72xf32>
    %19 = vector.shape_cast %18 : vector<2x16x72xf32> to vector<32x72xf32>
    %20 = arith.truncf %19 : vector<32x72xf32> to vector<32x72xbf16>
    %c2_17 = arith.constant 2 : index
    %c0_18 = arith.constant 0 : index
    %c0_19 = arith.constant 0 : index
    %21 = vector.load %arg1[%c2_17, %c0_18, %c0_19] : memref<3x72x128xbf16, #tpu.memory_space<vmem>>, vector<1x72x128xbf16>
    %22 = vector.shape_cast %21 : vector<1x72x128xbf16> to vector<72x128xbf16>
    %cst_20 = arith.constant dense<0.000000e+00> : vector<32x128xf32>
    %23 = tpu.matmul %20, %22, %cst_20 {dimension_numbers = #tpu.dot_dimension_numbers<[1], [0], [0], [1], [0, 0, 1, 1], [], []>} : vector<32x72xbf16>, vector<72x128xbf16>, vector<32x128xf32> -> vector<32x128xf32>
    %24 = arith.addf %16, %23 : vector<32x128xf32>
    %c0_21 = arith.constant 0 : index
    %c0_22 = arith.constant 0 : index
    %25 = vector.load %arg2[%c0_21, %c0_22] : memref<1x128xf32, #tpu.memory_space<vmem>>, vector<1x128xf32>
    %26 = vector.broadcast %25 : vector<1x128xf32> to vector<32x128xf32>
    %27 = arith.mulf %24, %26 : vector<32x128xf32>
    %c0_23 = arith.constant 0 : index
    %c0_24 = arith.constant 0 : index
    %28 = vector.load %arg3[%c0_23, %c0_24] : memref<1x128xf32, #tpu.memory_space<vmem>>, vector<1x128xf32>
    %29 = vector.broadcast %28 : vector<1x128xf32> to vector<32x128xf32>
    %30 = arith.addf %27, %29 : vector<32x128xf32>
    %cst_25 = arith.constant 0.000000e+00 : f32
    %31 = vector.broadcast %cst_25 : f32 to vector<32x128xf32>
    %32 = arith.maximumf %30, %31 : vector<32x128xf32>
    %33 = vector.extract_strided_slice %32 {offsets = [0, 0], sizes = [32, 64], strides = [1, 1]} : vector<32x128xf32> to vector<32x64xf32>
    %34 = vector.extract_strided_slice %32 {offsets = [0, 64], sizes = [32, 64], strides = [1, 1]} : vector<32x128xf32> to vector<32x64xf32>
    %35 = arith.maximumf %33, %34 : vector<32x64xf32>
    %c0_26 = arith.constant 0 : index
    %c0_27 = arith.constant 0 : index
    %36 = vector.load %arg4[%c0_26, %c0_27] : memref<32x64xf32, #tpu.memory_space<vmem>>, vector<32x64xf32>
    tpu.vector_store %arg4[%c0_26, %c0_27], %35 {strides = array<i32>} : memref<32x64xf32, #tpu.memory_space<vmem>>, vector<32x64xf32>,
    return
  }
}

module attributes {stable_mosaic.version = 11 : i64} {
  func.func @conv_bn_relu_pool_kernel(%arg0: memref<2x2x9x80xf32, #tpu.memory_space<vmem>>, %arg1: memref<3x80x64xbf16, #tpu.memory_space<vmem>>, %arg2: memref<1x64xf32, #tpu.memory_space<vmem>>, %arg3: memref<1x64xf32, #tpu.memory_space<vmem>>, %arg4: memref<16x32xf32, #tpu.memory_space<vmem>>) attributes {dimension_semantics = [], scalar_prefetch = 0 : i64, scratch_operands = 0 : i64, tpu.core_type = #tpu.core_type<tc>} {
    %cst = arith.constant 0.000000e+00 : f32
    %0 = vector.broadcast %cst : f32 to vector<16x64xf32>
    %c0 = arith.constant 0 : index
    %c0_0 = arith.constant 0 : index
    %c0_1 = arith.constant 0 : index
    %c0_2 = arith.constant 0 : index
    %1 = vector.load %arg0[%c0, %c0_0, %c0_1, %c0_2] : memref<2x2x9x80xf32, #tpu.memory_space<vmem>>, vector<1x2x8x80xf32>
    %2 = vector.shape_cast %1 : vector<1x2x8x80xf32> to vector<2x8x80xf32>
    %3 = vector.shape_cast %2 : vector<2x8x80xf32> to vector<16x80xf32>
    %4 = arith.truncf %3 : vector<16x80xf32> to vector<16x80xbf16>
    %c0_3 = arith.constant 0 : index
    %c0_4 = arith.constant 0 : index
    %c0_5 = arith.constant 0 : index
    %5 = vector.load %arg1[%c0_3, %c0_4, %c0_5] : memref<3x80x64xbf16, #tpu.memory_space<vmem>>, vector<1x80x64xbf16>
    %6 = vector.shape_cast %5 : vector<1x80x64xbf16> to vector<80x64xbf16>
    %cst_6 = arith.constant dense<0.000000e+00> : vector<16x64xf32>
    %7 = tpu.matmul %4, %6, %cst_6 {dimension_numbers = #tpu.dot_dimension_numbers<[1], [0], [0], [1], [0, 0, 1, 1], [], []>} : vector<16x80xbf16>, vector<80x64xbf16>, vector<16x64xf32> -> vector<16x64xf32>
    %8 = arith.addf %0, %7 : vector<16x64xf32>
    %c1 = arith.constant 1 : index
    %c0_7 = arith.constant 0 : index
    %c0_8 = arith.constant 0 : index
    %c0_9 = arith.constant 0 : index
    %9 = vector.load %arg0[%c1, %c0_7, %c0_8, %c0_9] : memref<2x2x9x80xf32, #tpu.memory_space<vmem>>, vector<1x2x8x80xf32>
    %10 = vector.shape_cast %9 : vector<1x2x8x80xf32> to vector<2x8x80xf32>
    %11 = vector.shape_cast %10 : vector<2x8x80xf32> to vector<16x80xf32>
    %12 = arith.truncf %11 : vector<16x80xf32> to vector<16x80xbf16>
    %c1_10 = arith.constant 1 : index
    %c0_11 = arith.constant 0 : index
    %c0_12 = arith.constant 0 : index
    %13 = vector.load %arg1[%c1_10, %c0_11, %c0_12] : memref<3x80x64xbf16, #tpu.memory_space<vmem>>, vector<1x80x64xbf16>
    %14 = vector.shape_cast %13 : vector<1x80x64xbf16> to vector<80x64xbf16>
    %cst_13 = arith.constant dense<0.000000e+00> : vector<16x64xf32>
    %15 = tpu.matmul %12, %14, %cst_13 {dimension_numbers = #tpu.dot_dimension_numbers<[1], [0], [0], [1], [0, 0, 1, 1], [], []>} : vector<16x80xbf16>, vector<80x64xbf16>, vector<16x64xf32> -> vector<16x64xf32>
    %16 = arith.addf %8, %15 : vector<16x64xf32>
    %c0_14 = arith.constant 0 : index
    %c0_15 = arith.constant 0 : index
    %c1_16 = arith.constant 1 : index
    %c0_17 = arith.constant 0 : index
    %17 = vector.load %arg0[%c0_14, %c0_15, %c1_16, %c0_17] : memref<2x2x9x80xf32, #tpu.memory_space<vmem>>, vector<1x2x8x80xf32>
    %18 = vector.shape_cast %17 : vector<1x2x8x80xf32> to vector<2x8x80xf32>
    %19 = vector.shape_cast %18 : vector<2x8x80xf32> to vector<16x80xf32>
    %20 = arith.truncf %19 : vector<16x80xf32> to vector<16x80xbf16>
    %c2 = arith.constant 2 : index
    %c0_18 = arith.constant 0 : index
    %c0_19 = arith.constant 0 : index
    %21 = vector.load %arg1[%c2, %c0_18, %c0_19] : memref<3x80x64xbf16, #tpu.memory_space<vmem>>, vector<1x80x64xbf16>
    %22 = vector.shape_cast %21 : vector<1x80x64xbf16> to vector<80x64xbf16>
    %cst_20 = arith.constant dense<0.000000e+00> : vector<16x64xf32>
    %23 = tpu.matmul %20, %22, %cst_20 {dimension_numbers = #tpu.dot_dimension_numbers<[1], [0], [0], [1], [0, 0, 1, 1], [], []>} : vector<16x80xbf16>, vector<80x64xbf16>, vector<16x64xf32> -> vector<16x64xf32>
    %24 = arith.addf %16, %23 : vector<16x64xf32>
    %c0_21 = arith.constant 0 : index
    %c0_22 = arith.constant 0 : index
    %25 = vector.load %arg2[%c0_21, %c0_22] : memref<1x64xf32, #tpu.memory_space<vmem>>, vector<1x64xf32>
    %26 = vector.broadcast %25 : vector<1x64xf32> to vector<16x64xf32>
    %27 = arith.mulf %24, %26 : vector<16x64xf32>
    %c0_23 = arith.constant 0 : index
    %c0_24 = arith.constant 0 : index
    %28 = vector.load %arg3[%c0_23, %c0_24] : memref<1x64xf32, #tpu.memory_space<vmem>>, vector<1x64xf32>
    %29 = vector.broadcast %28 : vector<1x64xf32> to vector<16x64xf32>
    %30 = arith.addf %27, %29 : vector<16x64xf32>
    %cst_25 = arith.constant 0.000000e+00 : f32
    %31 = vector.broadcast %cst_25 : f32 to vector<16x64xf32>
    %32 = arith.maximumf %30, %31 : vector<16x64xf32>
    %33 = vector.extract_strided_slice %32 {offsets = [0, 0], sizes = [16, 32], strides = [1, 1]} : vector<16x64xf32> to vector<16x32xf32>
    %34 = vector.extract_strided_slice %32 {offsets = [0, 32], sizes = [16, 32], strides = [1, 1]} : vector<16x64xf32> to vector<16x32xf32>
    %35 = arith.maximumf %33, %34 : vector<16x32xf32>
    %cst_26 = arith.constant 0.000000e+00 : f32
    %36 = vector.broadcast %cst_26 : f32 to vector<16x64xf32>
    %c1_27 = arith.constant 1 : index
    %c0_28 = arith.constant 0 : index
    %c0_29 = arith.constant 0 : index
    %c0_30 = arith.constant 0 : index
    %37 = vector.load %arg0[%c1_27, %c0_28, %c0_29, %c0_30] : memref<2x2x9x80xf32, #tpu.memory_space<vmem>>, vector<1x2x8x80xf32>
    %38 = vector.shape_cast %37 : vector<1x2x8x80xf32> to vector<2x8x80xf32>
    %39 = vector.shape_cast %38 : vector<2x8x80xf32> to vector<16x80xf32>
    %40 = arith.truncf %39 : vector<16x80xf32> to vector<16x80xbf16>
    %c0_31 = arith.constant 0 : index
    %c0_32 = arith.constant 0 : index
    %c0_33 = arith.constant 0 : index
    %41 = vector.load %arg1[%c0_31, %c0_32, %c0_33] : memref<3x80x64xbf16, #tpu.memory_space<vmem>>, vector<1x80x64xbf16>
    %42 = vector.shape_cast %41 : vector<1x80x64xbf16> to vector<80x64xbf16>
    %cst_34 = arith.constant dense<0.000000e+00> : vector<16x64xf32>
    %43 = tpu.matmul %40, %42, %cst_34 {dimension_numbers = #tpu.dot_dimension_numbers<[1], [0], [0], [1], [0, 0, 1, 1], [], []>} : vector<16x80xbf16>, vector<80x64xbf16>, vector<16x64xf32> -> vector<16x64xf32>
    %44 = arith.addf %36, %43 : vector<16x64xf32>
    %c0_35 = arith.constant 0 : index
    %c0_36 = arith.constant 0 : index
    %c1_37 = arith.constant 1 : index
    %c0_38 = arith.constant 0 : index
    %45 = vector.load %arg0[%c0_35, %c0_36, %c1_37, %c0_38] : memref<2x2x9x80xf32, #tpu.memory_space<vmem>>, vector<1x2x8x80xf32>
    %46 = vector.shape_cast %45 : vector<1x2x8x80xf32> to vector<2x8x80xf32>
    %47 = vector.shape_cast %46 : vector<2x8x80xf32> to vector<16x80xf32>
    %48 = arith.truncf %47 : vector<16x80xf32> to vector<16x80xbf16>
    %c1_39 = arith.constant 1 : index
    %c0_40 = arith.constant 0 : index
    %c0_41 = arith.constant 0 : index
    %49 = vector.load %arg1[%c1_39, %c0_40, %c0_41] : memref<3x80x64xbf16, #tpu.memory_space<vmem>>, vector<1x80x64xbf16>
    %50 = vector.shape_cast %49 : vector<1x80x64xbf16> to vector<80x64xbf16>
    %cst_42 = arith.constant dense<0.000000e+00> : vector<16x64xf32>
    %51 = tpu.matmul %48, %50, %cst_42 {dimension_numbers = #tpu.dot_dimension_numbers<[1], [0], [0], [1], [0, 0, 1, 1], [], []>} : vector<16x80xbf16>, vector<80x64xbf16>, vector<16x64xf32> -> vector<16x64xf32>
    %52 = arith.addf %44, %51 : vector<16x64xf32>
    %c1_43 = arith.constant 1 : index
    %c0_44 = arith.constant 0 : index
    %c1_45 = arith.constant 1 : index
    %c0_46 = arith.constant 0 : index
    %53 = vector.load %arg0[%c1_43, %c0_44, %c1_45, %c0_46] : memref<2x2x9x80xf32, #tpu.memory_space<vmem>>, vector<1x2x8x80xf32>
    %54 = vector.shape_cast %53 : vector<1x2x8x80xf32> to vector<2x8x80xf32>
    %55 = vector.shape_cast %54 : vector<2x8x80xf32> to vector<16x80xf32>
    %56 = arith.truncf %55 : vector<16x80xf32> to vector<16x80xbf16>
    %c2_47 = arith.constant 2 : index
    %c0_48 = arith.constant 0 : index
    %c0_49 = arith.constant 0 : index
    %57 = vector.load %arg1[%c2_47, %c0_48, %c0_49] : memref<3x80x64xbf16, #tpu.memory_space<vmem>>, vector<1x80x64xbf16>
    %58 = vector.shape_cast %57 : vector<1x80x64xbf16> to vector<80x64xbf16>
    %cst_50 = arith.constant dense<0.000000e+00> : vector<16x64xf32>
    %59 = tpu.matmul %56, %58, %cst_50 {dimension_numbers = #tpu.dot_dimension_numbers<[1], [0], [0], [1], [0, 0, 1, 1], [], []>} : vector<16x80xbf16>, vector<80x64xbf16>, vector<16x64xf32> -> vector<16x64xf32>
    %60 = arith.addf %52, %59 : vector<16x64xf32>
    %c0_51 = arith.constant 0 : index
    %c0_52 = arith.constant 0 : index
    %61 = vector.load %arg2[%c0_51, %c0_52] : memref<1x64xf32, #tpu.memory_space<vmem>>, vector<1x64xf32>
    %62 = vector.broadcast %61 : vector<1x64xf32> to vector<16x64xf32>
    %63 = arith.mulf %60, %62 : vector<16x64xf32>
    %c0_53 = arith.constant 0 : index
    %c0_54 = arith.constant 0 : index
    %64 = vector.load %arg3[%c0_53, %c0_54] : memref<1x64xf32, #tpu.memory_space<vmem>>, vector<1x64xf32>
    %65 = vector.broadcast %64 : vector<1x64xf32> to vector<16x64xf32>
    %66 = arith.addf %63, %65 : vector<16x64xf32>
    %cst_55 = arith.constant 0.000000e+00 : f32
    %67 = vector.broadcast %cst_55 : f32 to vector<16x64xf32>
    %68 = arith.maximumf %66, %67 : vector<16x64xf32>
    %69 = vector.extract_strided_slice %68 {offsets = [0, 0], sizes = [16, 32], strides = [1, 1]} : vector<16x64xf32> to vector<16x32xf32>
    %70 = vector.extract_strided_slice %68 {offsets = [0, 32], sizes = [16, 32], strides = [1, 1]} : vector<16x64xf32> to vector<16x32xf32>
    %71 = arith.maximumf %69, %70 : vector<16x32xf32>
    %72 = arith.maximumf %35, %71 : vector<16x32xf32>
    %c0_56 = arith.constant 0 : index
    %c0_57 = arith.constant 0 : index
    %73 = vector.load %arg4[%c0_56, %c0_57] : memref<16x32xf32, #tpu.memory_space<vmem>>, vector<16x32xf32>
    tpu.vector_store %arg4[%c0_56, %c0_57], %72 {strides = array<i32>} : memref<16x32xf32, #tpu.memory_space<vmem>>, vector<16x32xf32>,
    return
  }
}

module attributes {stable_mosaic.version = 11 : i64} {
  func.func @matmul_bias_kernel(%arg0: memref<16x32xbf16, #tpu.memory_space<vmem>>, %arg1: memref<32x96xbf16, #tpu.memory_space<vmem>>, %arg2: memref<1x96xf32, #tpu.memory_space<vmem>>, %arg3: memref<16x96xf32, #tpu.memory_space<vmem>>) attributes {dimension_semantics = [], scalar_prefetch = 0 : i64, scratch_operands = 0 : i64, tpu.core_type = #tpu.core_type<tc>} {
    %c0 = arith.constant 0 : index
    %c0_0 = arith.constant 0 : index
    %0 = vector.load %arg0[%c0, %c0_0] : memref<16x32xbf16, #tpu.memory_space<vmem>>, vector<16x32xbf16>
    %c0_1 = arith.constant 0 : index
    %c0_2 = arith.constant 0 : index
    %1 = vector.load %arg1[%c0_1, %c0_2] : memref<32x96xbf16, #tpu.memory_space<vmem>>, vector<32x96xbf16>
    %cst = arith.constant dense<0.000000e+00> : vector<16x96xf32>
    %2 = tpu.matmul %0, %1, %cst {dimension_numbers = #tpu.dot_dimension_numbers<[1], [0], [0], [1], [0, 0, 1, 1], [], []>} : vector<16x32xbf16>, vector<32x96xbf16>, vector<16x96xf32> -> vector<16x96xf32>
    %c0_3 = arith.constant 0 : index
    %c0_4 = arith.constant 0 : index
    %3 = vector.load %arg2[%c0_3, %c0_4] : memref<1x96xf32, #tpu.memory_space<vmem>>, vector<1x96xf32>
    %4 = vector.broadcast %3 : vector<1x96xf32> to vector<16x96xf32>
    %5 = arith.addf %2, %4 : vector<16x96xf32>
    %c0_5 = arith.constant 0 : index
    %c0_6 = arith.constant 0 : index
    %6 = vector.load %arg3[%c0_5, %c0_6] : memref<16x96xf32, #tpu.memory_space<vmem>>, vector<16x96xf32>
    tpu.vector_store %arg3[%c0_5, %c0_6], %5 {strides = array<i32>} : memref<16x96xf32, #tpu.memory_space<vmem>>, vector<16x96xf32>,
    return
  }
}

module attributes {stable_mosaic.version = 11 : i64} {
  func.func @gru_bidir_head_kernel(%arg0: i32, %arg1: memref<1x2x48xf32, #tpu.memory_space<vmem>>, %arg2: memref<1x2x48xf32, #tpu.memory_space<vmem>>, %arg3: memref<16x48xf32, #tpu.memory_space<vmem>>, %arg4: memref<16x48xf32, #tpu.memory_space<vmem>>, %arg5: memref<1x48xf32, #tpu.memory_space<vmem>>, %arg6: memref<1x48xf32, #tpu.memory_space<vmem>>, %arg7: memref<16x16xf32, #tpu.memory_space<vmem>>, %arg8: memref<1x16xf32, #tpu.memory_space<vmem>>, %arg9: memref<16x3xf32, #tpu.memory_space<vmem>>, %arg10: memref<1x3xf32, #tpu.memory_space<vmem>>, %arg11: memref<2x8x3xf32, #tpu.memory_space<vmem>>, %arg12: memref<2x16xf32, #tpu.memory_space<vmem>>, %arg13: memref<2x16xf32, #tpu.memory_space<vmem>>, %arg14: memref<8x2x16xf32, #tpu.memory_space<vmem>>, %arg15: memref<8x2x16xf32, #tpu.memory_space<vmem>>) attributes {dimension_semantics = [#tpu.dimension_semantics<arbitrary>], iteration_bounds = array<i64: 8>, scalar_prefetch = 0 : i64, scratch_operands = 4 : i64, tpu.core_type = #tpu.core_type<tc>, window_params = [{transform_indices = @transform_0, window_bounds = array<i64: 1, 2, 48>}, {transform_indices = @transform_1, window_bounds = array<i64: 1, 2, 48>}, {pipeline_mode = #tpu.pipeline_mode<synchronous>, transform_indices = @transform_2, window_bounds = array<i64: 16, 48>}, {pipeline_mode = #tpu.pipeline_mode<synchronous>, transform_indices = @transform_3, window_bounds = array<i64: 16, 48>}, {pipeline_mode = #tpu.pipeline_mode<synchronous>, transform_indices = @transform_4, window_bounds = array<i64: 1, 48>}, {pipeline_mode = #tpu.pipeline_mode<synchronous>, transform_indices = @transform_5, window_bounds = array<i64: 1, 48>}, {pipeline_mode = #tpu.pipeline_mode<synchronous>, transform_indices = @transform_6, window_bounds = array<i64: 16, 16>}, {pipeline_mode = #tpu.pipeline_mode<synchronous>, transform_indices = @transform_7, window_bounds = array<i64: 1, 16>}, {pipeline_mode = #tpu.pipeline_mode<synchronous>, transform_indices = @transform_8, window_bounds = array<i64: 16, 3>}, {pipeline_mode = #tpu.pipeline_mode<synchronous>, transform_indices = @transform_9, window_bounds = array<i64: 1, 3>}, {pipeline_mode = #tpu.pipeline_mode<synchronous>, transform_indices = @transform_10, window_bounds = array<i64: 2, 8, 3>}]} {
    %c0_i32 = arith.constant 0 : i32
    %0 = arith.cmpi eq, %arg0, %c0_i32 : i32
    %1 = arith.extui %0 : i1 to i32
    %c0_i32_0 = arith.constant 0 : i32
    %2 = arith.cmpi ne, %1, %c0_i32_0 : i32
    scf.if %2 {
      %cst_39 = arith.constant 0.000000e+00 : f32
      %89 = vector.broadcast %cst_39 : f32 to vector<2x16xf32>
      %c0_40 = arith.constant 0 : index
      %c0_41 = arith.constant 0 : index
      %90 = vector.load %arg12[%c0_40, %c0_41] : memref<2x16xf32, #tpu.memory_space<vmem>>, vector<2x16xf32>
      tpu.vector_store %arg12[%c0_40, %c0_41], %89 {strides = array<i32>} : memref<2x16xf32, #tpu.memory_space<vmem>>, vector<2x16xf32>,
      %cst_42 = arith.constant 0.000000e+00 : f32
      %91 = vector.broadcast %cst_42 : f32 to vector<2x16xf32>
      %c0_43 = arith.constant 0 : index
      %c0_44 = arith.constant 0 : index
      %92 = vector.load %arg13[%c0_43, %c0_44] : memref<2x16xf32, #tpu.memory_space<vmem>>, vector<2x16xf32>
      tpu.vector_store %arg13[%c0_43, %c0_44], %91 {strides = array<i32>} : memref<2x16xf32, #tpu.memory_space<vmem>>, vector<2x16xf32>,
    } else {
    }
    %c0 = arith.constant 0 : index
    %c0_1 = arith.constant 0 : index
    %c0_2 = arith.constant 0 : index
    %3 = vector.load %arg1[%c0, %c0_1, %c0_2] : memref<1x2x48xf32, #tpu.memory_space<vmem>>, vector<1x2x48xf32>
    %4 = vector.shape_cast %3 : vector<1x2x48xf32> to vector<2x48xf32>
    %c0_3 = arith.constant 0 : index
    %c0_4 = arith.constant 0 : index
    %5 = vector.load %arg12[%c0_3, %c0_4] : memref<2x16xf32, #tpu.memory_space<vmem>>, vector<2x16xf32>
    %c0_5 = arith.constant 0 : index
    %c0_6 = arith.constant 0 : index
    %6 = vector.load %arg3[%c0_5, %c0_6] : memref<16x48xf32, #tpu.memory_space<vmem>>, vector<16x48xf32>
    %cst = arith.constant dense<0.000000e+00> : vector<2x48xf32>
    %7 = tpu.matmul %5, %6, %cst {dimension_numbers = #tpu.dot_dimension_numbers<[1], [0], [0], [1], [0, 0, 1, 1], [], []>} : vector<2x16xf32>, vector<16x48xf32>, vector<2x48xf32> -> vector<2x48xf32>
    %c0_7 = arith.constant 0 : index
    %c0_8 = arith.constant 0 : index
    %8 = vector.load %arg5[%c0_7, %c0_8] : memref<1x48xf32, #tpu.memory_space<vmem>>, vector<1x48xf32>
    %9 = vector.broadcast %8 : vector<1x48xf32> to vector<2x48xf32>
    %10 = arith.addf %7, %9 : vector<2x48xf32>
    %11 = vector.extract_strided_slice %4 {offsets = [0, 0], sizes = [2, 16], strides = [1, 1]} : vector<2x48xf32> to vector<2x16xf32>
    %12 = vector.extract_strided_slice %10 {offsets = [0, 0], sizes = [2, 16], strides = [1, 1]} : vector<2x48xf32> to vector<2x16xf32>
    %13 = arith.addf %11, %12 : vector<2x16xf32>
    %cst_9 = arith.constant 0.000000e+00 : f32
    %14 = vector.broadcast %cst_9 : f32 to vector<2x16xf32>
    %15 = arith.subf %14, %13 : vector<2x16xf32>
    %16 = math.exp %15 : vector<2x16xf32>
    %cst_10 = arith.constant 1.000000e+00 : f32
    %17 = vector.broadcast %cst_10 : f32 to vector<2x16xf32>
    %18 = arith.addf %17, %16 : vector<2x16xf32>
    %19 = tpu.reciprocal %18 {approx = true} : vector<2x16xf32> -> vector<2x16xf32>
    %20 = vector.extract_strided_slice %4 {offsets = [0, 16], sizes = [2, 16], strides = [1, 1]} : vector<2x48xf32> to vector<2x16xf32>
    %21 = vector.extract_strided_slice %10 {offsets = [0, 16], sizes = [2, 16], strides = [1, 1]} : vector<2x48xf32> to vector<2x16xf32>
    %22 = arith.addf %20, %21 : vector<2x16xf32>
    %cst_11 = arith.constant 0.000000e+00 : f32
    %23 = vector.broadcast %cst_11 : f32 to vector<2x16xf32>
    %24 = arith.subf %23, %22 : vector<2x16xf32>
    %25 = math.exp %24 : vector<2x16xf32>
    %cst_12 = arith.constant 1.000000e+00 : f32
    %26 = vector.broadcast %cst_12 : f32 to vector<2x16xf32>
    %27 = arith.addf %26, %25 : vector<2x16xf32>
    %28 = tpu.reciprocal %27 {approx = true} : vector<2x16xf32> -> vector<2x16xf32>
    %29 = vector.extract_strided_slice %4 {offsets = [0, 32], sizes = [2, 16], strides = [1, 1]} : vector<2x48xf32> to vector<2x16xf32>
    %30 = vector.extract_strided_slice %10 {offsets = [0, 32], sizes = [2, 16], strides = [1, 1]} : vector<2x48xf32> to vector<2x16xf32>
    %31 = arith.mulf %19, %30 : vector<2x16xf32>
    %32 = arith.addf %29, %31 : vector<2x16xf32>
    %33 = math.tanh %32 : vector<2x16xf32>
    %cst_13 = arith.constant 1.000000e+00 : f32
    %34 = vector.broadcast %cst_13 : f32 to vector<2x16xf32>
    %35 = arith.subf %34, %28 : vector<2x16xf32>
    %36 = arith.mulf %35, %33 : vector<2x16xf32>
    %37 = arith.mulf %28, %5 : vector<2x16xf32>
    %38 = arith.addf %36, %37 : vector<2x16xf32>
    %c0_14 = arith.constant 0 : index
    %c0_15 = arith.constant 0 : index
    %c0_16 = arith.constant 0 : index
    %39 = vector.load %arg2[%c0_14, %c0_15, %c0_16] : memref<1x2x48xf32, #tpu.memory_space<vmem>>, vector<1x2x48xf32>
    %40 = vector.shape_cast %39 : vector<1x2x48xf32> to vector<2x48xf32>
    %c0_17 = arith.constant 0 : index
    %c0_18 = arith.constant 0 : index
    %41 = vector.load %arg13[%c0_17, %c0_18] : memref<2x16xf32, #tpu.memory_space<vmem>>, vector<2x16xf32>
    %c0_19 = arith.constant 0 : index
    %c0_20 = arith.constant 0 : index
    %42 = vector.load %arg4[%c0_19, %c0_20] : memref<16x48xf32, #tpu.memory_space<vmem>>, vector<16x48xf32>
    %cst_21 = arith.constant dense<0.000000e+00> : vector<2x48xf32>
    %43 = tpu.matmul %41, %42, %cst_21 {dimension_numbers = #tpu.dot_dimension_numbers<[1], [0], [0], [1], [0, 0, 1, 1], [], []>} : vector<2x16xf32>, vector<16x48xf32>, vector<2x48xf32> -> vector<2x48xf32>
    %c0_22 = arith.constant 0 : index
    %c0_23 = arith.constant 0 : index
    %44 = vector.load %arg6[%c0_22, %c0_23] : memref<1x48xf32, #tpu.memory_space<vmem>>, vector<1x48xf32>
    %45 = vector.broadcast %44 : vector<1x48xf32> to vector<2x48xf32>
    %46 = arith.addf %43, %45 : vector<2x48xf32>
    %47 = vector.extract_strided_slice %40 {offsets = [0, 0], sizes = [2, 16], strides = [1, 1]} : vector<2x48xf32> to vector<2x16xf32>
    %48 = vector.extract_strided_slice %46 {offsets = [0, 0], sizes = [2, 16], strides = [1, 1]} : vector<2x48xf32> to vector<2x16xf32>
    %49 = arith.addf %47, %48 : vector<2x16xf32>
    %cst_24 = arith.constant 0.000000e+00 : f32
    %50 = vector.broadcast %cst_24 : f32 to vector<2x16xf32>
    %51 = arith.subf %50, %49 : vector<2x16xf32>
    %52 = math.exp %51 : vector<2x16xf32>
    %cst_25 = arith.constant 1.000000e+00 : f32
    %53 = vector.broadcast %cst_25 : f32 to vector<2x16xf32>
    %54 = arith.addf %53, %52 : vector<2x16xf32>
    %55 = tpu.reciprocal %54 {approx = true} : vector<2x16xf32> -> vector<2x16xf32>
    %56 = vector.extract_strided_slice %40 {offsets = [0, 16], sizes = [2, 16], strides = [1, 1]} : vector<2x48xf32> to vector<2x16xf32>
    %57 = vector.extract_strided_slice %46 {offsets = [0, 16], sizes = [2, 16], strides = [1, 1]} : vector<2x48xf32> to vector<2x16xf32>
    %58 = arith.addf %56, %57 : vector<2x16xf32>
    %cst_26 = arith.constant 0.000000e+00 : f32
    %59 = vector.broadcast %cst_26 : f32 to vector<2x16xf32>
    %60 = arith.subf %59, %58 : vector<2x16xf32>
    %61 = math.exp %60 : vector<2x16xf32>
    %cst_27 = arith.constant 1.000000e+00 : f32
    %62 = vector.broadcast %cst_27 : f32 to vector<2x16xf32>
    %63 = arith.addf %62, %61 : vector<2x16xf32>
    %64 = tpu.reciprocal %63 {approx = true} : vector<2x16xf32> -> vector<2x16xf32>
    %65 = vector.extract_strided_slice %40 {offsets = [0, 32], sizes = [2, 16], strides = [1, 1]} : vector<2x48xf32> to vector<2x16xf32>
    %66 = vector.extract_strided_slice %46 {offsets = [0, 32], sizes = [2, 16], strides = [1, 1]} : vector<2x48xf32> to vector<2x16xf32>
    %67 = arith.mulf %55, %66 : vector<2x16xf32>
    %68 = arith.addf %65, %67 : vector<2x16xf32>
    %69 = math.tanh %68 : vector<2x16xf32>
    %cst_28 = arith.constant 1.000000e+00 : f32
    %70 = vector.broadcast %cst_28 : f32 to vector<2x16xf32>
    %71 = arith.subf %70, %64 : vector<2x16xf32>
    %72 = arith.mulf %71, %69 : vector<2x16xf32>
    %73 = arith.mulf %64, %41 : vector<2x16xf32>
    %74 = arith.addf %72, %73 : vector<2x16xf32>
    %c0_29 = arith.constant 0 : index
    %c0_30 = arith.constant 0 : index
    %75 = vector.load %arg12[%c0_29, %c0_30] : memref<2x16xf32, #tpu.memory_space<vmem>>, vector<2x16xf32>
    tpu.vector_store %arg12[%c0_29, %c0_30], %38 {strides = array<i32>} : memref<2x16xf32, #tpu.memory_space<vmem>>, vector<2x16xf32>,
    %c0_31 = arith.constant 0 : index
    %c0_32 = arith.constant 0 : index
    %76 = vector.load %arg13[%c0_31, %c0_32] : memref<2x16xf32, #tpu.memory_space<vmem>>, vector<2x16xf32>
    tpu.vector_store %arg13[%c0_31, %c0_32], %74 {strides = array<i32>} : memref<2x16xf32, #tpu.memory_space<vmem>>, vector<2x16xf32>,
    %77 = arith.index_cast %arg0 : i32 to index
    %c0_33 = arith.constant 0 : index
    %c0_34 = arith.constant 0 : index
    %78 = vector.load %arg14[%77, %c0_33, %c0_34] : memref<8x2x16xf32, #tpu.memory_space<vmem>>, vector<1x2x16xf32>
    %79 = vector.shape_cast %78 : vector<1x2x16xf32> to vector<2x16xf32>
    %80 = vector.shape_cast %38 : vector<2x16xf32> to vector<1x2x16xf32>
    tpu.vector_store %arg14[%77, %c0_33, %c0_34], %80 {strides = array<i32>} : memref<8x2x16xf32, #tpu.memory_space<vmem>>, vector<1x2x16xf32>,
    %c7_i32 = arith.constant 7 : i32
    %81 = arith.subi %c7_i32, %arg0 : i32
    %82 = arith.index_cast %81 : i32 to index
    %c0_35 = arith.constant 0 : index
    %c0_36 = arith.constant 0 : index
    %83 = vector.load %arg15[%82, %c0_35, %c0_36] : memref<8x2x16xf32, #tpu.memory_space<vmem>>, vector<1x2x16xf32>
    %84 = vector.shape_cast %83 : vector<1x2x16xf32> to vector<2x16xf32>
    %85 = vector.shape_cast %74 : vector<2x16xf32> to vector<1x2x16xf32>
    tpu.vector_store %arg15[%82, %c0_35, %c0_36], %85 {strides = array<i32>} : memref<8x2x16xf32, #tpu.memory_space<vmem>>, vector<1x2x16xf32>,
    %c7_i32_37 = arith.constant 7 : i32
    %86 = arith.cmpi eq, %arg0, %c7_i32_37 : i32
    %87 = arith.extui %86 : i1 to i32
    %c0_i32_38 = arith.constant 0 : i32
    %88 = arith.cmpi ne, %87, %c0_i32_38 : i32
    scf.if %88 {
      %c0_39 = arith.constant 0 : index
      %c0_40 = arith.constant 0 : index
      %c0_41 = arith.constant 0 : index
      %89 = vector.load %arg15[%c0_39, %c0_40, %c0_41] : memref<8x2x16xf32, #tpu.memory_space<vmem>>, vector<8x1x16xf32>
      %90 = vector.shape_cast %89 : vector<8x1x16xf32> to vector<8x16xf32>
      %91 = math.tanh %90 : vector<8x16xf32>
      %c0_42 = arith.constant 0 : index
      %c0_43 = arith.constant 0 : index
      %c0_44 = arith.constant 0 : index
      %92 = vector.load %arg14[%c0_42, %c0_43, %c0_44] : memref<8x2x16xf32, #tpu.memory_space<vmem>>, vector<8x1x16xf32>
      %93 = vector.shape_cast %92 : vector<8x1x16xf32> to vector<8x16xf32>
      %94 = math.tanh %93 : vector<8x16xf32>
      %95 = arith.mulf %91, %94 : vector<8x16xf32>
      %c0_45 = arith.constant 0 : index
      %c0_46 = arith.constant 0 : index
      %96 = vector.load %arg7[%c0_45, %c0_46] : memref<16x16xf32, #tpu.memory_space<vmem>>, vector<16x16xf32>
      %cst_47 = arith.constant dense<0.000000e+00> : vector<8x16xf32>
      %97 = tpu.matmul %95, %96, %cst_47 {dimension_numbers = #tpu.dot_dimension_numbers<[1], [0], [0], [1], [0, 0, 1, 1], [], []>} : vector<8x16xf32>, vector<16x16xf32>, vector<8x16xf32> -> vector<8x16xf32>
      %c0_48 = arith.constant 0 : index
      %c0_49 = arith.constant 0 : index
      %98 = vector.load %arg8[%c0_48, %c0_49] : memref<1x16xf32, #tpu.memory_space<vmem>>, vector<1x16xf32>
      %99 = vector.broadcast %98 : vector<1x16xf32> to vector<8x16xf32>
      %100 = arith.addf %97, %99 : vector<8x16xf32>
      %c0_50 = arith.constant 0 : index
      %c0_51 = arith.constant 0 : index
      %101 = vector.load %arg9[%c0_50, %c0_51] : memref<16x3xf32, #tpu.memory_space<vmem>>, vector<16x3xf32>
      %cst_52 = arith.constant dense<0.000000e+00> : vector<8x3xf32>
      %102 = tpu.matmul %100, %101, %cst_52 {dimension_numbers = #tpu.dot_dimension_numbers<[1], [0], [0], [1], [0, 0, 1, 1], [], []>} : vector<8x16xf32>, vector<16x3xf32>, vector<8x3xf32> -> vector<8x3xf32>
      %c0_53 = arith.constant 0 : index
      %c0_54 = arith.constant 0 : index
      %103 = vector.load %arg10[%c0_53, %c0_54] : memref<1x3xf32, #tpu.memory_space<vmem>>, vector<1x3xf32>
      %104 = vector.broadcast %103 : vector<1x3xf32> to vector<8x3xf32>
      %105 = arith.addf %102, %104 : vector<8x3xf32>
      %106 = math.tanh %105 : vector<8x3xf32>
      %c0_55 = arith.constant 0 : index
      %c0_56 = arith.constant 0 : index
      %c0_57 = arith.constant 0 : index
      %107 = vector.load %arg11[%c0_55, %c0_56, %c0_57] : memref<2x8x3xf32, #tpu.memory_space<vmem>>, vector<1x8x3xf32>
      %108 = vector.shape_cast %107 : vector<1x8x3xf32> to vector<8x3xf32>
      %109 = vector.shape_cast %106 : vector<8x3xf32> to vector<1x8x3xf32>
      tpu.vector_store %arg11[%c0_55, %c0_56, %c0_57], %109 {strides = array<i32>} : memref<2x8x3xf32, #tpu.memory_space<vmem>>, vector<1x8x3xf32>,
      %c0_58 = arith.constant 0 : index
      %c1 = arith.constant 1 : index
      %c0_59 = arith.constant 0 : index
      %110 = vector.load %arg15[%c0_58, %c1, %c0_59] : memref<8x2x16xf32, #tpu.memory_space<vmem>>, vector<8x1x16xf32>
      %111 = vector.shape_cast %110 : vector<8x1x16xf32> to vector<8x16xf32>
      %112 = math.tanh %111 : vector<8x16xf32>
      %c0_60 = arith.constant 0 : index
      %c1_61 = arith.constant 1 : index
      %c0_62 = arith.constant 0 : index
      %113 = vector.load %arg14[%c0_60, %c1_61, %c0_62] : memref<8x2x16xf32, #tpu.memory_space<vmem>>, vector<8x1x16xf32>
      %114 = vector.shape_cast %113 : vector<8x1x16xf32> to vector<8x16xf32>
      %115 = math.tanh %114 : vector<8x16xf32>
      %116 = arith.mulf %112, %115 : vector<8x16xf32>
      %c0_63 = arith.constant 0 : index
      %c0_64 = arith.constant 0 : index
      %117 = vector.load %arg7[%c0_63, %c0_64] : memref<16x16xf32, #tpu.memory_space<vmem>>, vector<16x16xf32>
      %cst_65 = arith.constant dense<0.000000e+00> : vector<8x16xf32>
      %118 = tpu.matmul %116, %117, %cst_65 {dimension_numbers = #tpu.dot_dimension_numbers<[1], [0], [0], [1], [0, 0, 1, 1], [], []>} : vector<8x16xf32>, vector<16x16xf32>, vector<8x16xf32> -> vector<8x16xf32>
      %c0_66 = arith.constant 0 : index
      %c0_67 = arith.constant 0 : index
      %119 = vector.load %arg8[%c0_66, %c0_67] : memref<1x16xf32, #tpu.memory_space<vmem>>, vector<1x16xf32>
      %120 = vector.broadcast %119 : vector<1x16xf32> to vector<8x16xf32>
      %121 = arith.addf %118, %120 : vector<8x16xf32>
      %c0_68 = arith.constant 0 : index
      %c0_69 = arith.constant 0 : index
      %122 = vector.load %arg9[%c0_68, %c0_69] : memref<16x3xf32, #tpu.memory_space<vmem>>, vector<16x3xf32>
      %cst_70 = arith.constant dense<0.000000e+00> : vector<8x3xf32>
      %123 = tpu.matmul %121, %122, %cst_70 {dimension_numbers = #tpu.dot_dimension_numbers<[1], [0], [0], [1], [0, 0, 1, 1], [], []>} : vector<8x16xf32>, vector<16x3xf32>, vector<8x3xf32> -> vector<8x3xf32>
      %c0_71 = arith.constant 0 : index
      %c0_72 = arith.constant 0 : index
      %124 = vector.load %arg10[%c0_71, %c0_72] : memref<1x3xf32, #tpu.memory_space<vmem>>, vector<1x3xf32>
      %125 = vector.broadcast %124 : vector<1x3xf32> to vector<8x3xf32>
      %126 = arith.addf %123, %125 : vector<8x3xf32>
      %127 = math.tanh %126 : vector<8x3xf32>
      %c1_73 = arith.constant 1 : index
      %c0_74 = arith.constant 0 : index
      %c0_75 = arith.constant 0 : index
      %128 = vector.load %arg11[%c1_73, %c0_74, %c0_75] : memref<2x8x3xf32, #tpu.memory_space<vmem>>, vector<1x8x3xf32>
      %129 = vector.shape_cast %128 : vector<1x8x3xf32> to vector<8x3xf32>
      %130 = vector.shape_cast %127 : vector<8x3xf32> to vector<1x8x3xf32>
      tpu.vector_store %arg11[%c1_73, %c0_74, %c0_75], %130 {strides = array<i32>} : memref<2x8x3xf32, #tpu.memory_space<vmem>>, vector<1x8x3xf32>,
    } else {
    }
    return
  }
  func.func @transform_0(%arg0: i32) -> (i32, i32, i32) {
    %c0_i32 = arith.constant 0 : i32
    %c0_i32_0 = arith.constant 0 : i32
    %c0_i32_1 = arith.constant 0 : i32
    return %arg0, %c0_i32, %c0_i32_0 : i32, i32, i32
  }
  func.func @transform_1(%arg0: i32) -> (i32, i32, i32) {
    %c7_i32 = arith.constant 7 : i32
    %0 = arith.subi %c7_i32, %arg0 : i32
    %c0_i32 = arith.constant 0 : i32
    %c0_i32_0 = arith.constant 0 : i32
    %c0_i32_1 = arith.constant 0 : i32
    return %0, %c0_i32, %c0_i32_0 : i32, i32, i32
  }
  func.func @transform_2(%arg0: i32) -> (i32, i32) {
    %c0_i32 = arith.constant 0 : i32
    %c0_i32_0 = arith.constant 0 : i32
    %c0_i32_1 = arith.constant 0 : i32
    return %c0_i32, %c0_i32_0 : i32, i32
  }
  func.func @transform_3(%arg0: i32) -> (i32, i32) {
    %c0_i32 = arith.constant 0 : i32
    %c0_i32_0 = arith.constant 0 : i32
    %c0_i32_1 = arith.constant 0 : i32
    return %c0_i32, %c0_i32_0 : i32, i32
  }
  func.func @transform_4(%arg0: i32) -> (i32, i32) {
    %c0_i32 = arith.constant 0 : i32
    %c0_i32_0 = arith.constant 0 : i32
    %c0_i32_1 = arith.constant 0 : i32
    return %c0_i32, %c0_i32_0 : i32, i32
  }
  func.func @transform_5(%arg0: i32) -> (i32, i32) {
    %c0_i32 = arith.constant 0 : i32
    %c0_i32_0 = arith.constant 0 : i32
    %c0_i32_1 = arith.constant 0 : i32
    return %c0_i32, %c0_i32_0 : i32, i32
  }
  func.func @transform_6(%arg0: i32) -> (i32, i32) {
    %c0_i32 = arith.constant 0 : i32
    %c0_i32_0 = arith.constant 0 : i32
    %c0_i32_1 = arith.constant 0 : i32
    return %c0_i32, %c0_i32_0 : i32, i32
  }
  func.func @transform_7(%arg0: i32) -> (i32, i32) {
    %c0_i32 = arith.constant 0 : i32
    %c0_i32_0 = arith.constant 0 : i32
    %c0_i32_1 = arith.constant 0 : i32
    return %c0_i32, %c0_i32_0 : i32, i32
  }
  func.func @transform_8(%arg0: i32) -> (i32, i32) {
    %c0_i32 = arith.constant 0 : i32
    %c0_i32_0 = arith.constant 0 : i32
    %c0_i32_1 = arith.constant 0 : i32
    return %c0_i32, %c0_i32_0 : i32, i32
  }
  func.func @transform_9(%arg0: i32) -> (i32, i32) {
    %c0_i32 = arith.constant 0 : i32
    %c0_i32_0 = arith.constant 0 : i32
    %c0_i32_1 = arith.constant 0 : i32
    return %c0_i32, %c0_i32_0 : i32, i32
  }
  func.func @transform_10(%arg0: i32) -> (i32, i32, i32) {
    %c0_i32 = arith.constant 0 : i32
    %c0_i32_0 = arith.constant 0 : i32
    %c0_i32_1 = arith.constant 0 : i32
    %c0_i32_2 = arith.constant 0 : i32
    return %c0_i32, %c0_i32_0, %c0_i32_1 : i32, i32, i32
  }
}

</mosaic_0001>

<bundles_post_ra>
// kernel: tile.23
= control target key start
LH: loop header
LB: loop body
LE: loop exit
PB: predicated region body
PF: predicated region fallthrough
CT: control target
= control target key end

     0   :  { %s28_s0 = inlined_call_operand.vmem [shape: f32[8], index: 0, kind: input, shape index: {}]   ;;  %s29_s1 = inlined_call_operand.vmem [shape: f32[16,8], index: 1, kind: output, shape index: {}]  }
   0x1   :  { %v4_v0 = vld [vmem:[%s28_s0] ss:$0 sm:$0xff] }
   0x2   :  { %5 = vst [vmem:[%s29_s1] sm:$0xff] %v4_v0  ;;  %8 = vst [vmem:[%s29_s1 + $0x8] sm:$0xff] %v4_v0 }

// kernel: tile.24
= control target key start
LH: loop header
LB: loop body
LE: loop exit
PB: predicated region body
PF: predicated region fallthrough
CT: control target
= control target key end

     0   :  { %s131_s10 = smov 120   ;;  %s132_s11 = smov 104   ;;  %vm3_vm0 = vcmask 64512   ;;  %vm9_vm1 = vcmask 1048512   ;;  %vm15_vm2 = vcmask 982912   ;;  %vm21_vm3 = vcmask 917312   ;;  %s207_s0 = inlined_call_operand.vmem [shape: f32[16,8], index: 0, kind: input, shape index: {}]   ;;  %s208_s1 = inlined_call_operand.vmem [shape: f32[1,128], index: 1, kind: output, shape index: {}]  }
   0x1   :  { %v101_v0 = vld [vmem:[%s207_s0 + $0xf] sm:$0x1]   ;;  %v103_v1 = vld [vmem:[%s207_s0 + $0xd] sm:$0x1]   ;;  %v102_v2 = vld [vmem:[%s207_s0 + $0xe] sm:$0x1]  }
   0x2   :  { %7 = vrot.lane.b32.xlu0 %v101_v0, %s131_s10  ;;  %19 = vrot.lane.b32.xlu1 %v103_v1, %s132_s11  ;;  %v104_v3 = vld [vmem:[%s207_s0 + $0xc] sm:$0x1]   ;;  %s133_s16 = smov 112   ;;  %s134_s17 = smov 96   ;;  %v105_v4 = vld [vmem:[%s207_s0 + $0xb] sm:$0x1]  }
   0x3   :  { %v106_v5 = vld [vmem:[%s207_s0 + $0xa] sm:$0x1]   ;;  %v2_v6 = vld [vmem:[%s207_s0] sm:$0x1]   ;;  %s135_s24 = smov 88   ;;  %s136_s25 = smov 80  }
   0x4   :  { %4 = vst.msk [vmem:[#allocation0] sm:$0x1] %vm3_vm0, %v2_v6   ;;  %v107_v7 = vld [vmem:[%s207_s0 + $0x9] sm:$0x1]   ;;  %v108_v8 = vld [vmem:[%s207_s0 + $0x8] sm:$0x1]  }
   0x5   :  { %s137_s30 = smov 72   ;;  %s138_s2 = smov 64   ;;  %v109_v9 = vld [vmem:[%s207_s0 + $0x7] sm:$0x1]   ;;  %v110_v10 = vld [vmem:[%s207_s0 + $0x6] sm:$0x1]  }
   0x6   :  { %13 = vrot.lane.b32.xlu0 %v102_v2, %s133_s16  ;;  %25 = vrot.lane.b32.xlu1 %v104_v3, %s134_s17  ;;  %s139_s7 = smov 56   ;;  %s140_s8 = smov 48   ;;  %v111_v11 = vld [vmem:[%s207_s0 + $0x5] sm:$0x1]   ;;  %v112_v12 = vld [vmem:[%s207_s0 + $0x4] sm:$0x1]  }
   0x7   :  { %s141_s13 = smov 40   ;;  %s142_s14 = smov 32   ;;  %v113_v13 = vld [vmem:[%s207_s0 + $0x3] sm:$0x1]   ;;  %v114_v14 = vld [vmem:[%s207_s0 + $0x2] sm:$0x1]  }
   0x8   :  { %s143_s19 = smov 24   ;;  %s144_s20 = smov 16   ;;  %v115_v15 = vld [vmem:[%s207_s0 + $0x1] sm:$0x1]   ;;  %vm27_vm4 = vcmask 851712   ;;  %vm33_vm5 = vcmask 786112  }
   0x9   :  { %s145_s0 = smov 8   ;;  %vm39_vm6 = vcmask 720512   ;;  %vm45_vm7 = vcmask 654912   ;;  %vm51_vm8 = vcmask 589312   ;;  %vm57_vm9 = vcmask 523712  }
   0xa   :  { %31 = vrot.lane.b32.xlu0 %v105_v4, %s135_s24  ;;  %37 = vrot.lane.b32.xlu1 %v106_v5, %s136_s25  ;;  %vm63_vm10 = vcmask 458112   ;;  %vm69_vm11 = vcmask 392512   ;;  %vm75_vm12 = vcmask 326912   ;;  %vm81_vm13 = vcmask 261312  }
   0xb   :  { %vm87_vm14 = vcmask 195712   ;;  %vm93_vm15 = vcmask 130112  }
   0xe   :  { %43 = vrot.lane.b32.xlu0 %v107_v7, %s137_s30  ;;  %49 = vrot.lane.b32.xlu1 %v108_v8, %s138_s2 }
  0x12   :  { %55 = vrot.lane.b32.xlu0 %v109_v9, %s139_s7  ;;  %61 = vrot.lane.b32.xlu1 %v110_v10, %s140_s8 }
  0x16   :  { %67 = vrot.lane.b32.xlu0 %v111_v11, %s141_s13  ;;  %73 = vrot.lane.b32.xlu1 %v112_v12, %s142_s14 }
  0x1a   :  { %79 = vrot.lane.b32.xlu0 %v113_v13, %s143_s19  ;;  %85 = vrot.lane.b32.xlu1 %v114_v14, %s144_s20 }
  0x1e   :  { %91 = vrot.lane.b32.xlu0 %v115_v15, %s145_s0 }
  0x74   :  { %v8_v16 = vpop.permute.xlu0 %7   ;;  %v20_v17 = vpop.permute.xlu1 %19  }
  0x75   :  { %10 = vst.msk [vmem:[#allocation0] sm:$0x1] %vm9_vm1, %v8_v16  }
  0x78   :  { %v14_v18 = vpop.permute.xlu0 %13   ;;  %v26_v19 = vpop.permute.xlu1 %25  }
  0x79   :  { %16 = vst.msk [vmem:[#allocation0] sm:$0x1] %vm15_vm2, %v14_v18  }
  0x7a   :  { %22 = vst.msk [vmem:[#allocation0] sm:$0x1] %vm21_vm3, %v20_v17  }
  0x7b   :  { %28 = vst.msk [vmem:[#allocation0] sm:$0x1] %vm27_vm4, %v26_v19  }
  0x7c   :  { %v32_v20 = vpop.permute.xlu0 %31   ;;  %v38_v21 = vpop.permute.xlu1 %37  }
  0x7d   :  { %34 = vst.msk [vmem:[#allocation0] sm:$0x1] %vm33_vm5, %v32_v20  }
  0x7e   :  { %40 = vst.msk [vmem:[#allocation0] sm:$0x1] %vm39_vm6, %v38_v21  }
  0x80   :  { %v44_v22 = vpop.permute.xlu0 %43   ;;  %v50_v23 = vpop.permute.xlu1 %49  }
  0x81   :  { %46 = vst.msk [vmem:[#allocation0] sm:$0x1] %vm45_vm7, %v44_v22  }
  0x82   :  { %52 = vst.msk [vmem:[#allocation0] sm:$0x1] %vm51_vm8, %v50_v23  }
  0x84   :  { %v56_v24 = vpop.permute.xlu0 %55   ;;  %v62_v25 = vpop.permute.xlu1 %61  }
  0x85   :  { %58 = vst.msk [vmem:[#allocation0] sm:$0x1] %vm57_vm9, %v56_v24  }
  0x86   :  { %64 = vst.msk [vmem:[#allocation0] sm:$0x1] %vm63_vm10, %v62_v25  }
  0x88   :  { %v68_v26 = vpop.permute.xlu0 %67   ;;  %v74_v27 = vpop.permute.xlu1 %73  }
  0x89   :  { %70 = vst.msk [vmem:[#allocation0] sm:$0x1] %vm69_vm11, %v68_v26  }
  0x8a   :  { %76 = vst.msk [vmem:[#allocation0] sm:$0x1] %vm75_vm12, %v74_v27  }
  0x8c   :  { %v80_v28 = vpop.permute.xlu0 %79   ;;  %v86_v29 = vpop.permute.xlu1 %85  }
  0x8d   :  { %82 = vst.msk [vmem:[#allocation0] sm:$0x1] %vm81_vm13, %v80_v28  }
  0x8e   :  { %88 = vst.msk [vmem:[#allocation0] sm:$0x1] %vm87_vm14, %v86_v29  }
  0x90   :  { %v92_v30 = vpop.permute.xlu0 %91  }
  0x91   :  { %94 = vst.msk [vmem:[#allocation0] sm:$0x1] %vm93_vm15, %v92_v30  }
  0x98   :  { %v98_v31 = vld [vmem:[#allocation0] sm:$0x1] }
  0x99   :  { %100 = vst [vmem:[%s208_s1] sm:$0x1] %v98_v31 }

// kernel: _lambda_.4
= control target key start
LH: loop header
LB: loop body
LE: loop exit
PB: predicated region body
PF: predicated region fallthrough
CT: control target
= control target key end

     0   :  { %vm76_vm0 = vcmask 588800   ;;  %vm83_vm1 = vcmask 1043456   ;;  %vm372_vm2 = vcmask 523264   ;;  %s649_s1 = inlined_call_operand.vmem [shape: bf16[3,72,128], index: 1, kind: input, shape index: {}]   ;;  %s650_s0 = inlined_call_operand.vmem [shape: f32[1,2,18,72], index: 0, kind: input, shape index: {}]   ;;  %s651_s2 = inlined_call_operand.vmem [shape: f32[1,128], index: 2, kind: input, shape index: {}]   ;;  %s652_s3 = inlined_call_operand.vmem [shape: f32[1,128], index: 3, kind: input, shape index: {}]   ;;  %s653_s4 = inlined_call_operand.vmem [shape: f32[32,64], index: 4, kind: output, shape index: {}]  }
   0x1   :  { %v497_v0 = vld [vmem:[%s649_s1] sm:$0xff]   ;;  %v498_v1 = vld [vmem:[%s649_s1 + $0x8] sm:$0xff]   ;;  %v499_v2 = vld [vmem:[%s649_s1 + $0x10] sm:$0xff]  }
   0x2   :  { %457 = vmatprep.subr.bf16.mxu0 %v497_v0  ;;  %v502_v3 = vld [vmem:[%s649_s1 + $0x24] sm:$0xff]   ;;  %v500_v7 = vld [vmem:[%s649_s1 + $0x18] sm:$0xff]   ;;  %v504_v8 = vld [vmem:[%s649_s1 + $0x2c] sm:$0xff]  }
   0x3   :  { %458 = vmatpush3.bf16.msra.mxu0 %v497_v0  ;;  %v18_v4 = vld [vmem:[%s650_s0] sm:$0xff]  ;;  %v19_v5 = vld [vmem:[%s650_s0 + $0x8] sm:$0xff]  ;;  %443 = vmatprep.subr.bf16.mxu1 %v502_v3  ;;  %v506_v9 = vld [vmem:[%s649_s1 + $0x34] sm:$0xff]  }
   0x4   :  { %459 = vmatprep.subr.bf16.mxu0 %v498_v1  ;;  %v22_v6 = vpack.c.bf16 %v19_v5, %v18_v4  ;;  %444 = vmatpush3.bf16.msra.mxu1 %v502_v3  ;;  %v501_v10 = vld [vmem:[%s649_s1 + $0x20] ss:$0 sps:$4 sm:$0xff]   ;;  %v20_v12 = vld [vmem:[%s650_s0 + $0x18] sm:$0xff]  ;;  %v33_v13 = vld [vmem:[%s650_s0 + $0x1] sm:$0xff] }
   0x5   :  { %445 = vmatprep.subr.bf16.mxu1 %v504_v8  ;;  %v508_v11 = vld [vmem:[%s649_s1 + $0x3c] sm:$0xff]   ;;  %v34_v15 = vld [vmem:[%s650_s0 + $0x9] sm:$0xff]  ;;  %v170_v16 = vsel %vm83_vm1, %v501_v10, 0  ;;  %v510_v20 = vld [vmem:[%s649_s1 + $0x44] ss:$0 sps:$4 sm:$0xff]  }
   0x6   :  { %467 = vmatprep.mubr.msk.bf16.mxu0 %vm76_vm0, %v22_v6  ;;  %v21_v14 = vld [vmem:[%s650_s0 + $0x20] sm:$0xff]  ;;  %v503_v17 = vld [vmem:[%s649_s1 + $0x48] sm:$0xff]   ;;  %v37_v18 = vpack.c.bf16 %v34_v15, %v33_v13  ;;  %v505_v24 = vld [vmem:[%s649_s1 + $0x50] sm:$0xff]   ;;  %v85_v27 = vsel %vm83_vm1, %v510_v20, 0 }
   0x7   :  { %460 = vmatpush3.bf16.msra.mxu0 %v498_v1  ;;  %v221_v19 = vld [vmem:[%s650_s0 + $0x2] sm:$0xff]  ;;  %v222_v21 = vld [vmem:[%s650_s0 + $0xa] sm:$0xff]  ;;  %v23_v22 = vpack.c.bf16 %v21_v14, %v20_v12  ;;  %v35_v25 = vld [vmem:[%s650_s0 + $0x19] sm:$0xff] }
   0x8   :  { %461 = vmatprep.subr.bf16.mxu0 %v499_v2  ;;  %446 = vmatpush3.bf16.msra.mxu1 %v504_v8  ;;  %v225_v23 = vpack.c.bf16 %v222_v21, %v221_v19  ;;  %v36_v26 = vld [vmem:[%s650_s0 + $0x21] sm:$0xff]  ;;  %v507_v29 = vld [vmem:[%s649_s1 + $0x58] sm:$0xff]   ;;  %v420_v41 = vld [vmem:[%s651_s2] ss:$0 sm:$0xff]  ;;  %s512_s2 = smov 64  }
   0x9   :  { %447 = vmatprep.subr.bf16.mxu1 %v506_v9  ;;  %453 = vmatprep.mubr.msk.bf16.mxu1 %vm76_vm0, %v37_v18  ;;  %v38_v28 = vpack.c.bf16 %v36_v26, %v35_v25  ;;  %v509_v30 = vld [vmem:[%s649_s1 + $0x60] sm:$0xff]   ;;  %v511_v31 = vld [vmem:[%s649_s1 + $0x68] ss:$0 sps:$4 sm:$0xff]  }
   0xa   :  { %v223_v32 = vld [vmem:[%s650_s0 + $0x1a] sm:$0xff]  ;;  %v224_v33 = vld [vmem:[%s650_s0 + $0x22] sm:$0xff]  ;;  %v271_v34 = vsel %vm83_vm1, %v511_v31, 0 }
   0xb   :  { %462 = vmatpush3.bf16.msra.mxu0 %v499_v2  ;;  %v226_v35 = vpack.c.bf16 %v224_v33, %v223_v32  ;;  %v421_v46 = vld [vmem:[%s652_s3] ss:$0 sm:$0xff] }
   0xc   :  { %463 = vmatprep.subr.bf16.mxu0 %v500_v7  ;;  %448 = vmatpush3.bf16.msra.mxu1 %v506_v9 }
   0xd   :  { %449 = vmatprep.subr.bf16.mxu1 %v508_v11 }
   0xf   :  { %464 = vmatpush3.bf16.msra.mxu0 %v500_v7 }
  0x10   :  { %494 = vmatprep.subr.msk.bf16.mxu0 %vm83_vm1, %v501_v10  ;;  %450 = vmatpush3.bf16.msra.mxu1 %v508_v11 }
  0x11   :  { %493 = vmatprep.subr.msk.bf16.mxu1 %vm83_vm1, %v510_v20 }
  0x13   :  { %466 = vmatpush3.bf16.msra.mxu0 %v170_v16 }
  0x14   :  { %471 = vmatprep.subr.bf16.mxu0 %v503_v17  ;;  %452 = vmatpush3.bf16.msra.mxu1 %v85_v27 }
  0x16   :  { %468 = vmatmul.mubr.msk.bf16.vlgmr.msra.gmra.mrb[0].mxu0 %vm76_vm0, %v23_v22 }
  0x17   :  { %472 = vmatpush3.bf16.msra.mxu0 %v503_v17  ;;  %481 = vmatprep.mubr.msk.bf16.mxu0 %vm76_vm0, %v225_v23 }
  0x18   :  { %473 = vmatprep.subr.bf16.mxu0 %v505_v24  ;;  %454 = vmatmul.mubr.msk.bf16.vlgmr.msra.gmra.mrb[0].mxu1 %vm76_vm0, %v38_v28 }
  0x1b   :  { %474 = vmatpush3.bf16.msra.mxu0 %v505_v24 }
  0x1c   :  { %475 = vmatprep.subr.bf16.mxu0 %v507_v29 }
  0x1f   :  { %476 = vmatpush3.bf16.msra.mxu0 %v507_v29 }
  0x20   :  { %477 = vmatprep.subr.bf16.mxu0 %v509_v30 }
  0x23   :  { %478 = vmatpush3.bf16.msra.mxu0 %v509_v30 }
  0x24   :  { %495 = vmatprep.subr.msk.bf16.mxu0 %vm83_vm1, %v511_v31 }
  0x27   :  { %480 = vmatpush3.bf16.msra.mxu0 %v271_v34 }
  0x2a   :  { %482 = vmatmul.mubr.msk.bf16.vlgmr.msra.gmra.mrb[0].mxu0 %vm76_vm0, %v226_v35 }
  0xeb   :  { %v455_v36 = vpop.f32.mrb[0].mxu1 }
  0xec   :  { %v121_v37 = vpop.f32.mrb[1].mxu1 }
  0xed   :  { %v456_v38 = vpop.f32.mrb[2].mxu1 }
  0xee   :  { %v124_v39 = vpop.f32.mrb[3].mxu1 }
  0xfd   :  { %v483_v40 = vpop.f32.mrb[0].mxu0 }
  0xfe   :  { %v485_v42 = vadd.f32 %v483_v40, %v455_v36  ;;  %v307_v43 = vpop.f32.mrb[1].mxu0 }
  0xff   :  { %v486_v44 = vadd.f32 %v307_v43, %v121_v37  ;;  %v484_v45 = vpop.f32.mrb[2].mxu0 }
 0x100   :  { %v335_v47 = vmul.f32 %v485_v42, %v420_v41  ;;  %v487_v48 = vadd.f32 %v484_v45, %v456_v38  ;;  %v310_v49 = vpop.f32.mrb[3].mxu0 }
 0x101   :  { %v333_v50 = vmul.f32 %v486_v44, %v420_v41  ;;  %v488_v51 = vadd.f32 %v310_v49, %v124_v39 }
 0x102   :  { %v336_v52 = vmul.f32 %v487_v48, %v420_v41  ;;  %v346_v53 = vadd.f32 %v421_v46, %v335_v47 }
 0x103   :  { %v334_v54 = vmul.f32 %v488_v51, %v420_v41  ;;  %v344_v55 = vadd.f32 %v421_v46, %v333_v50 }
 0x104   :  { %v350_v56 = vmax.f32 %v346_v53, 0.0  ;;  %v347_v57 = vadd.f32 %v421_v46, %v336_v52 }
 0x105   :  { %v348_v58 = vmax.f32 %v344_v55, 0.0  ;;  %v345_v59 = vadd.f32 %v421_v46, %v334_v54 }
 0x106   :  { %360 = vrot.lane.b32.xlu1 %v350_v56, %s512_s2  ;;  %v351_v60 = vmax.f32 %v347_v57, 0.0 }
 0x107   :  { %356 = vrot.lane.b32.xlu0 %v348_v58, %s512_s2  ;;  %v349_v61 = vmax.f32 %v345_v59, 0.0 }
 0x10a   :  { %362 = vrot.lane.b32.xlu1 %v351_v60, %s512_s2 }
 0x10b   :  { %358 = vrot.lane.b32.xlu0 %v349_v61, %s512_s2 }
 0x178   :  { %v361_v62 = vpop.permute.xlu1 %360 }
 0x179   :  { %v370_v63 = vmax.f32 %v350_v56, %v361_v62  ;;  %v357_v0 = vpop.permute.xlu0 %356 }
 0x17a   :  { %v368_v1 = vmax.f32 %v348_v58, %v357_v0 }
 0x17b   :  { %375 = vst.msk [vmem:[%s653_s4 + $0x10] sm:$0xff] %vm372_vm2, %v370_v63 }
 0x17c   :  { %373 = vst.msk [vmem:[%s653_s4] sm:$0xff] %vm372_vm2, %v368_v1  ;;  %v363_v2 = vpop.permute.xlu1 %362 }
 0x17d   :  { %v371_v3 = vmax.f32 %v351_v60, %v363_v2  ;;  %v359_v4 = vpop.permute.xlu0 %358 }
 0x17e   :  { %v369_v5 = vmax.f32 %v349_v61, %v359_v4 }
 0x17f   :  { %376 = vst.msk [vmem:[%s653_s4 + $0x18] sm:$0xff] %vm372_vm2, %v371_v3 }
 0x180   :  { %374 = vst.msk [vmem:[%s653_s4 + $0x8] sm:$0xff] %vm372_vm2, %v369_v5 }

// kernel: tile.33
= control target key start
LH: loop header
LB: loop body
LE: loop exit
PB: predicated region body
PF: predicated region fallthrough
CT: control target
= control target key end

     0   :  { %s22_s0 = inlined_call_operand.vmem [shape: f32[8], index: 0, kind: input, shape index: {}]   ;;  %s23_s1 = inlined_call_operand.vmem [shape: f32[8,8], index: 1, kind: output, shape index: {}]  }
   0x1   :  { %v4_v0 = vld [vmem:[%s22_s0] ss:$0 sm:$0xff] }
   0x2   :  { %5 = vst [vmem:[%s23_s1] sm:$0xff] %v4_v0 }

// kernel: tile.34
= control target key start
LH: loop header
LB: loop body
LE: loop exit
PB: predicated region body
PF: predicated region fallthrough
CT: control target
= control target key end

     0   :  { %s67_s10 = smov 56   ;;  %s68_s11 = smov 40   ;;  %vm3_vm0 = vcmask 64512   ;;  %vm9_vm1 = vcmask 523712   ;;  %vm15_vm2 = vcmask 458112   ;;  %vm21_vm3 = vcmask 392512   ;;  %s111_s0 = inlined_call_operand.vmem [shape: f32[8,8], index: 0, kind: input, shape index: {}]   ;;  %s112_s1 = inlined_call_operand.vmem [shape: f32[1,64], index: 1, kind: output, shape index: {}]  }
   0x1   :  { %v53_v0 = vld [vmem:[%s111_s0 + $0x7] sm:$0x1]   ;;  %v55_v1 = vld [vmem:[%s111_s0 + $0x5] sm:$0x1]   ;;  %v54_v2 = vld [vmem:[%s111_s0 + $0x6] sm:$0x1]  }
   0x2   :  { %7 = vrot.lane.b32.xlu0 %v53_v0, %s67_s10  ;;  %19 = vrot.lane.b32.xlu1 %v55_v1, %s68_s11  ;;  %v56_v3 = vld [vmem:[%s111_s0 + $0x4] sm:$0x1]   ;;  %v2_v4 = vld [vmem:[%s111_s0] sm:$0x1]   ;;  %s69_s18 = smov 48   ;;  %s70_s19 = smov 32  }
   0x3   :  { %4 = vst.msk [vmem:[#allocation0] sm:$0x1] %vm3_vm0, %v2_v4   ;;  %v57_v5 = vld [vmem:[%s111_s0 + $0x3] sm:$0x1]   ;;  %v58_v6 = vld [vmem:[%s111_s0 + $0x2] sm:$0x1]  }
   0x4   :  { %s71_s24 = smov 24   ;;  %s72_s25 = smov 16   ;;  %v59_v7 = vld [vmem:[%s111_s0 + $0x1] sm:$0x1]   ;;  %vm27_vm4 = vcmask 326912   ;;  %vm33_vm5 = vcmask 261312  }
   0x5   :  { %s73_s0 = smov 8   ;;  %vm39_vm6 = vcmask 195712   ;;  %vm45_vm7 = vcmask 130112  }
   0x6   :  { %13 = vrot.lane.b32.xlu0 %v54_v2, %s69_s18  ;;  %25 = vrot.lane.b32.xlu1 %v56_v3, %s70_s19 }
   0xa   :  { %31 = vrot.lane.b32.xlu0 %v57_v5, %s71_s24  ;;  %37 = vrot.lane.b32.xlu1 %v58_v6, %s72_s25 }
   0xe   :  { %43 = vrot.lane.b32.xlu0 %v59_v7, %s73_s0 }
  0x74   :  { %v8_v8 = vpop.permute.xlu0 %7   ;;  %v20_v9 = vpop.permute.xlu1 %19  }
  0x75   :  { %10 = vst.msk [vmem:[#allocation0] sm:$0x1] %vm9_vm1, %v8_v8  }
  0x78   :  { %v14_v10 = vpop.permute.xlu0 %13   ;;  %v26_v11 = vpop.permute.xlu1 %25  }
  0x79   :  { %16 = vst.msk [vmem:[#allocation0] sm:$0x1] %vm15_vm2, %v14_v10  }
  0x7a   :  { %22 = vst.msk [vmem:[#allocation0] sm:$0x1] %vm21_vm3, %v20_v9  }
  0x7b   :  { %28 = vst.msk [vmem:[#allocation0] sm:$0x1] %vm27_vm4, %v26_v11  }
  0x7c   :  { %v32_v12 = vpop.permute.xlu0 %31   ;;  %v38_v13 = vpop.permute.xlu1 %37  }
  0x7d   :  { %34 = vst.msk [vmem:[#allocation0] sm:$0x1] %vm33_vm5, %v32_v12  }
  0x7e   :  { %40 = vst.msk [vmem:[#allocation0] sm:$0x1] %vm39_vm6, %v38_v13  }
  0x80   :  { %v44_v14 = vpop.permute.xlu0 %43  }
  0x81   :  { %46 = vst.msk [vmem:[#allocation0] sm:$0x1] %vm45_vm7, %v44_v14  }
  0x88   :  { %v50_v15 = vld [vmem:[#allocation0] sm:$0x1] }
  0x89   :  { %52 = vst [vmem:[%s112_s1] sm:$0x1] %v50_v15 }

// kernel: _lambda_.5
= control target key start
LH: loop header
LB: loop body
LE: loop exit
PB: predicated region body
PF: predicated region fallthrough
CT: control target
= control target key end

     0   :  { %v672_v0 = vmov 0.0   ;;  %vm673_vm0 = vmmov 0   ;;  %vm76_vm1 = vcmask 654336   ;;  %vm464_vm2 = vcmask 261120   ;;  %s833_s1 = inlined_call_operand.vmem [shape: bf16[3,80,64], index: 1, kind: input, shape index: {}]   ;;  %s834_s0 = inlined_call_operand.vmem [shape: f32[2,2,9,80], index: 0, kind: input, shape index: {}]   ;;  %s835_s2 = inlined_call_operand.vmem [shape: f32[1,64], index: 2, kind: input, shape index: {}]   ;;  %s836_s3 = inlined_call_operand.vmem [shape: f32[1,64], index: 3, kind: input, shape index: {}]   ;;  %s837_s4 = inlined_call_operand.vmem [shape: f32[16,32], index: 4, kind: output, shape index: {}]  }
   0x1   :  { %554 = vmatprep.subr.bf16.mxu0 %v672_v0  ;;  %596 = vmatprep.subr.bf16.mxu1 %v672_v0  ;;  %v657_v1 = vld [vmem:[%s833_s1 + $0x28] sm:$0xff]   ;;  %v658_v2 = vld [vmem:[%s833_s1 + $0x30] sm:$0xff]   ;;  %v659_v3 = vld [vmem:[%s833_s1 + $0x38] sm:$0xff]  }
   0x2   :  { %564 = vmatprep.mubr.msk.bf16.mxu0 %vm673_vm0, %v672_v0  ;;  %606 = vmatprep.mubr.msk.bf16.mxu1 %vm673_vm0, %v672_v0  ;;  %v660_v4 = vld [vmem:[%s833_s1 + $0x40] sm:$0xff]   ;;  %v661_v5 = vld [vmem:[%s833_s1 + $0x48] sm:$0xff]   ;;  %v472_v7 = vld [vmem:[%s834_s0 + $0x30] sm:$0xff] }
   0x3   :  { %555 = vmatpush3.bf16.msra.mxu0 %v657_v1  ;;  %597 = vmatpush3.bf16.msra.mxu1 %v657_v1  ;;  %v471_v6 = vld [vmem:[%s834_s0 + $0x20] sm:$0xff]  ;;  %v196_v9 = vld [vmem:[%s834_s0 + $0x11] sm:$0xff]  ;;  %v663_v13 = vld [vmem:[%s833_s1 + $0x8] sm:$0xff]  }
   0x4   :  { %556 = vmatprep.subr.bf16.mxu0 %v672_v0  ;;  %598 = vmatprep.subr.bf16.mxu1 %v672_v0  ;;  %v195_v8 = vld [vmem:[%s834_s0 + $0x1] sm:$0xff]  ;;  %v34_v10 = vpack.c.bf16 %v472_v7, %v471_v6  ;;  %v664_v14 = vld [vmem:[%s833_s1 + $0x10] sm:$0xff]   ;;  %v665_v15 = vld [vmem:[%s833_s1 + $0x18] sm:$0xff]  }
   0x5   :  { %v741_v11 = vpack.c.bf16 %v196_v9, %v195_v8  ;;  %v662_v12 = vld [vmem:[%s833_s1] sm:$0xff]   ;;  %v19_v18 = vld [vmem:[%s834_s0 + $0x10] sm:$0xff]  ;;  %v668_v21 = vld [vmem:[%s833_s1 + $0x58] sm:$0xff]  }
   0x6   :  { %v666_v16 = vld [vmem:[%s833_s1 + $0x20] sm:$0xff]   ;;  %v667_v20 = vld [vmem:[%s833_s1 + $0x50] sm:$0xff]   ;;  %v670_v23 = vld [vmem:[%s833_s1 + $0x68] sm:$0xff]  }
   0x7   :  { %557 = vmatpush3.bf16.msra.mxu0 %v658_v2  ;;  %599 = vmatpush3.bf16.msra.mxu1 %v658_v2  ;;  %v18_v17 = vld [vmem:[%s834_s0] sm:$0xff]  ;;  %v671_v24 = vld [vmem:[%s833_s1 + $0x70] sm:$0xff]  }
   0x8   :  { %558 = vmatprep.subr.bf16.mxu0 %v672_v0  ;;  %600 = vmatprep.subr.bf16.mxu1 %v672_v0  ;;  %v20_v19 = vpack.c.bf16 %v19_v18, %v18_v17  ;;  %v669_v22 = vld [vmem:[%s833_s1 + $0x60] sm:$0xff]   ;;  %v516_v26 = vld [vmem:[%s834_s0 + $0x31] sm:$0xff] }
   0x9   :  { %v515_v25 = vld [vmem:[%s834_s0 + $0x21] sm:$0xff]  ;;  %v511_v28 = vld [vmem:[%s835_s2] ss:$0 sm:$0xff]  ;;  %s674_s2 = smov 96  }
   0xa   :  { %v399_v27 = vpack.c.bf16 %v516_v26, %v515_v25  ;;  %v512_v31 = vld [vmem:[%s836_s3] ss:$0 sm:$0xff] }
   0xb   :  { %559 = vmatpush3.bf16.msra.mxu0 %v659_v3  ;;  %601 = vmatpush3.bf16.msra.mxu1 %v659_v3 }
   0xc   :  { %560 = vmatprep.subr.bf16.mxu0 %v672_v0  ;;  %602 = vmatprep.subr.bf16.mxu1 %v672_v0 }
   0xf   :  { %561 = vmatpush3.bf16.msra.mxu0 %v660_v4  ;;  %603 = vmatpush3.bf16.msra.mxu1 %v660_v4 }
  0x10   :  { %562 = vmatprep.subr.bf16.mxu0 %v672_v0  ;;  %604 = vmatprep.subr.bf16.mxu1 %v672_v0 }
  0x13   :  { %563 = vmatpush3.bf16.msra.mxu0 %v661_v5  ;;  %605 = vmatpush3.bf16.msra.mxu1 %v661_v5 }
  0x14   :  { %568 = vmatprep.subr.bf16.mxu0 %v672_v0  ;;  %610 = vmatprep.subr.bf16.mxu1 %v672_v0 }
  0x16   :  { %565 = vmatmul.mubr.msk.bf16.vlgmr.msra.gmra.mrb[0].mxu0 %vm76_vm1, %v34_v10  ;;  %607 = vmatmul.mubr.msk.bf16.vlgmr.msra.gmra.mrb[0].mxu1 %vm76_vm1, %v741_v11 }
  0x17   :  { %569 = vmatpush3.bf16.msra.mxu0 %v662_v12  ;;  %611 = vmatpush3.bf16.msra.mxu1 %v662_v12 }
  0x18   :  { %570 = vmatprep.subr.bf16.mxu0 %v672_v0  ;;  %612 = vmatprep.subr.bf16.mxu1 %v672_v0 }
  0x19   :  { %578 = vmatprep.mubr.msk.bf16.mxu0 %vm673_vm0, %v672_v0  ;;  %620 = vmatprep.mubr.msk.bf16.mxu1 %vm673_vm0, %v672_v0 }
  0x1b   :  { %571 = vmatpush3.bf16.msra.mxu0 %v663_v13  ;;  %613 = vmatpush3.bf16.msra.mxu1 %v663_v13 }
  0x1c   :  { %572 = vmatprep.subr.bf16.mxu0 %v672_v0  ;;  %614 = vmatprep.subr.bf16.mxu1 %v672_v0 }
  0x1f   :  { %573 = vmatpush3.bf16.msra.mxu0 %v664_v14  ;;  %615 = vmatpush3.bf16.msra.mxu1 %v664_v14 }
  0x20   :  { %574 = vmatprep.subr.bf16.mxu0 %v672_v0  ;;  %616 = vmatprep.subr.bf16.mxu1 %v672_v0 }
  0x23   :  { %575 = vmatpush3.bf16.msra.mxu0 %v665_v15  ;;  %617 = vmatpush3.bf16.msra.mxu1 %v665_v15 }
  0x24   :  { %576 = vmatprep.subr.bf16.mxu0 %v672_v0  ;;  %618 = vmatprep.subr.bf16.mxu1 %v672_v0 }
  0x27   :  { %577 = vmatpush3.bf16.msra.mxu0 %v666_v16  ;;  %619 = vmatpush3.bf16.msra.mxu1 %v666_v16 }
  0x28   :  { %582 = vmatprep.subr.bf16.mxu0 %v672_v0  ;;  %624 = vmatprep.subr.bf16.mxu1 %v672_v0 }
  0x2a   :  { %579 = vmatmul.mubr.msk.bf16.vlgmr.msra.gmra.mrb[0].mxu0 %vm76_vm1, %v20_v19  ;;  %621 = vmatmul.mubr.msk.bf16.vlgmr.msra.gmra.mrb[0].mxu1 %vm76_vm1, %v34_v10 }
  0x2b   :  { %583 = vmatpush3.bf16.msra.mxu0 %v667_v20  ;;  %625 = vmatpush3.bf16.msra.mxu1 %v667_v20 }
  0x2c   :  { %584 = vmatprep.subr.bf16.mxu0 %v672_v0  ;;  %626 = vmatprep.subr.bf16.mxu1 %v672_v0 }
  0x2d   :  { %592 = vmatprep.mubr.msk.bf16.mxu0 %vm673_vm0, %v672_v0  ;;  %634 = vmatprep.mubr.msk.bf16.mxu1 %vm673_vm0, %v672_v0 }
  0x2f   :  { %585 = vmatpush3.bf16.msra.mxu0 %v668_v21  ;;  %627 = vmatpush3.bf16.msra.mxu1 %v668_v21 }
  0x30   :  { %586 = vmatprep.subr.bf16.mxu0 %v672_v0  ;;  %628 = vmatprep.subr.bf16.mxu1 %v672_v0 }
  0x33   :  { %587 = vmatpush3.bf16.msra.mxu0 %v669_v22  ;;  %629 = vmatpush3.bf16.msra.mxu1 %v669_v22 }
  0x34   :  { %588 = vmatprep.subr.bf16.mxu0 %v672_v0  ;;  %630 = vmatprep.subr.bf16.mxu1 %v672_v0 }
  0x37   :  { %589 = vmatpush3.bf16.msra.mxu0 %v670_v23  ;;  %631 = vmatpush3.bf16.msra.mxu1 %v670_v23 }
  0x38   :  { %590 = vmatprep.subr.bf16.mxu0 %v672_v0  ;;  %632 = vmatprep.subr.bf16.mxu1 %v672_v0 }
  0x3b   :  { %591 = vmatpush3.bf16.msra.mxu0 %v671_v24  ;;  %633 = vmatpush3.bf16.msra.mxu1 %v671_v24 }
  0x3e   :  { %593 = vmatmul.mubr.msk.bf16.vlgmr.msra.gmra.mrb[0].mxu0 %vm76_vm1, %v741_v11  ;;  %635 = vmatmul.mubr.msk.bf16.vlgmr.msra.gmra.mrb[0].mxu1 %vm76_vm1, %v399_v27 }
 0x111   :  { %v276_v29 = vpop.f32.mrb[0].mxu0  ;;  %v437_v30 = vpop.f32.mrb[0].mxu1 }
 0x112   :  { %v292_v32 = vmul.f32 %v511_v28, %v276_v29  ;;  %v446_v33 = vmul.f32 %v511_v28, %v437_v30  ;;  %v594_v34 = vpop.f32.mrb[1].mxu0  ;;  %v636_v35 = vpop.f32.mrb[1].mxu1 }
 0x113   :  { %v279_v36 = vpop.f32.mrb[2].mxu0  ;;  %v440_v37 = vpop.f32.mrb[2].mxu1 }
 0x114   :  { %v293_v38 = vmul.f32 %v511_v28, %v279_v36  ;;  %v447_v39 = vmul.f32 %v511_v28, %v440_v37  ;;  %v595_v40 = vpop.f32.mrb[3].mxu0  ;;  %v637_v41 = vpop.f32.mrb[3].mxu1  ;;  %v448_v42 = vadd.f32 %v512_v31, %v446_v33  ;;  %v301_v43 = vadd.f32 %v512_v31, %v292_v32 }
 0x116   :  { %v302_v44 = vadd.f32 %v512_v31, %v293_v38  ;;  %v449_v45 = vadd.f32 %v512_v31, %v447_v39  ;;  %v450_v46 = vmax.f32 %v448_v42, 0.0  ;;  %v303_v47 = vmax.f32 %v301_v43, 0.0 }
 0x118   :  { %454 = vrot.lane.b32.xlu1 %v450_v46, %s674_s2  ;;  %307 = vrot.lane.b32.xlu0 %v303_v47, %s674_s2  ;;  %v304_v48 = vmax.f32 %v302_v44, 0.0  ;;  %v451_v49 = vmax.f32 %v449_v45, 0.0 }
 0x11c   :  { %456 = vrot.lane.b32.xlu1 %v451_v49, %s674_s2  ;;  %309 = vrot.lane.b32.xlu0 %v304_v48, %s674_s2 }
 0x18a   :  { %v455_v50 = vpop.permute.xlu1 %454  ;;  %v308_v51 = vpop.permute.xlu0 %307 }
 0x18b   :  { %v460_v52 = vmax.f32 %v450_v46, %v455_v50  ;;  %v313_v53 = vmax.f32 %v303_v47, %v308_v51 }
 0x18d   :  { %v462_v54 = vmax.f32 %v313_v53, %v460_v52 }
 0x18e   :  { %v457_v55 = vpop.permute.xlu1 %456  ;;  %v310_v56 = vpop.permute.xlu0 %309 }
 0x18f   :  { %465 = vst.msk [vmem:[%s837_s4] sm:$0xff] %vm464_vm2, %v462_v54  ;;  %v461_v57 = vmax.f32 %v451_v49, %v457_v55  ;;  %v314_v58 = vmax.f32 %v304_v48, %v310_v56 }
 0x191   :  { %v463_v59 = vmax.f32 %v314_v58, %v461_v57 }
 0x193   :  { %466 = vst.msk [vmem:[%s837_s4 + $0x8] sm:$0xff] %vm464_vm2, %v463_v59 }

// kernel: _lambda_.6
= control target key start
LH: loop header
LB: loop body
LE: loop exit
PB: predicated region body
PF: predicated region fallthrough
CT: control target
= control target key end

     0   :  { %v118_v0 = vmov 0.0   ;;  %vm119_vm0 = vmmov 0   ;;  %vm45_vm1 = vcmask 261120   ;;  %vm90_vm2 = vcmask 785408   ;;  %s158_s1 = inlined_call_operand.vmem [shape: bf16[32,96], index: 1, kind: input, shape index: {}]   ;;  %s159_s0 = inlined_call_operand.vmem [shape: bf16[16,32], index: 0, kind: input, shape index: {}]   ;;  %s160_s2 = inlined_call_operand.vmem [shape: f32[1,96], index: 2, kind: input, shape index: {}]   ;;  %s161_s3 = inlined_call_operand.vmem [shape: f32[16,96], index: 3, kind: output, shape index: {}]  }
   0x1   :  { %105 = vmatprep.subr.bf16.mxu0 %v118_v0  ;;  %v115_v1 = vld [vmem:[%s158_s1] sm:$0xff]   ;;  %109 = vmatprep.mubr.msk.bf16.mxu0 %vm119_vm0, %v118_v0  ;;  %v116_v2 = vld [vmem:[%s158_s1 + $0x8] sm:$0xff]  }
   0x2   :  { %106 = vmatpush3.bf16.msra.mxu0 %v115_v1  ;;  %v117_v3 = vld [vmem:[%s159_s0] sm:$0xff]  }
   0x3   :  { %107 = vmatprep.subr.bf16.mxu0 %v118_v0  ;;  %v97_v4 = vld [vmem:[%s160_s2] ss:$0 sm:$0xff] }
   0x6   :  { %108 = vmatpush3.bf16.msra.mxu0 %v116_v2 }
   0x9   :  { %110 = vmatmul.mubr.msk.bf16.vlgmr.msra.gmra.mrb[0].mxu0 %vm45_vm1, %v117_v3 }
  0xdc   :  { %v83_v5 = vpop.f32.mrb[0].mxu0 }
  0xdd   :  { %v84_v6 = vadd.f32 %v97_v4, %v83_v5  ;;  %v111_v7 = vpop.f32.mrb[1].mxu0 }
  0xde   :  { %v86_v8 = vpop.f32.mrb[2].mxu0 }
  0xdf   :  { %91 = vst.msk [vmem:[%s161_s3] sm:$0xff] %vm90_vm2, %v84_v6  ;;  %v87_v9 = vadd.f32 %v97_v4, %v86_v8  ;;  %v112_v10 = vpop.f32.mrb[3].mxu0 }
  0xe1   :  { %92 = vst.msk [vmem:[%s161_s3 + $0x8] sm:$0xff] %vm90_vm2, %v87_v9 }

// kernel: _lambda_.7
= control target key start
LH: loop header
LB: loop body
LE: loop exit
PB: predicated region body
PF: predicated region fallthrough
CT: control target
= control target key end

     0   :  { %s1403_s13 = smov 0   ;;  %s1517_s0 = inlined_call_operand.vmem [shape: f32[8,2,48], index: 0, kind: input, shape index: {}]   ;;  %s1518_s1 = inlined_call_operand.vmem [shape: f32[8,2,48], index: 1, kind: input, shape index: {}]   ;;  %s1519_s2 = inlined_call_operand.vmem [shape: f32[16,48], index: 2, kind: input, shape index: {}]   ;;  %s1520_s3 = inlined_call_operand.vmem [shape: f32[16,48], index: 3, kind: input, shape index: {}]   ;;  %s1521_s4 = inlined_call_operand.vmem [shape: f32[1,48], index: 4, kind: input, shape index: {}]   ;;  %s1522_s5 = inlined_call_operand.vmem [shape: f32[1,48], index: 5, kind: input, shape index: {}]   ;;  %s1523_s6 = inlined_call_operand.vmem [shape: f32[16,16], index: 6, kind: input, shape index: {}]   ;;  %s1524_s7 = inlined_call_operand.vmem [shape: f32[1,16], index: 7, kind: input, shape index: {}]   ;;  %s1525_s8 = inlined_call_operand.vmem [shape: f32[16,3], index: 8, kind: input, shape index: {}]   ;;  %s1526_s9 = inlined_call_operand.vmem [shape: f32[1,3], index: 9, kind: input, shape index: {}]   ;;  %s1527_s10 = inlined_call_operand.vmem [shape: f32[2,8,3], index: 10, kind: output, shape index: {}]  }
   0x1 LB: > { %s1409_s14 = sadd.s32 4294967295, %s1335_s13   ;;  %p1130_p0 = scmp.ge.s32.totalorder %s1335_s13, 1  ;;  %s1335_s13 = sphi %s1403_s13, %s20_s13  }
   0x2   : > { %p319_p1 = scmp.lt.s32.totalorder %s1335_s13, 9 }
   0x4   : > { %p320_p2 = pnand %p1130_p0, %p319_p1 }
   0x5   : > { %p356_p3 = scmp.lt.s32.totalorder (!%p320_p2), %s1409_s14, 7  ;;  %s1415_s15 = ssub.s32 (!%p320_p2), 7, %s1409_s14 }
   0x6   : > { %323 = sbr.rel (%p320_p2) target bundleno = 1220 (0x4c4), region = 60  ;;  %p361_p4 = scmp.lt.s32.totalorder (!%p320_p2), %s1415_s15, 7 }
   0x7   : > { %p1133_p5 = scmp.ne.s32.totalorder (!%p320_p2), %s1409_s14, 0 }
   0xd   : > { %s357_s16 = scalar_select %p356_p3, %s1409_s14, 7 }
   0xe   : > { %s362_s17 = scalar_select %p361_p4, %s1415_s15, 7 }
   0xf   : > { %s1131_s18 = sshll.u32 %s357_s16, 1  ;;  %369 = sbr.rel (%p1133_p5) target bundleno = 22 (0x16), region = 64  ;;  %vm370_vm0 = vcmask (!%p1133_p5), 123904   ;;  %v1337_v0 = vmov (!%p1133_p5), 0.0  }
  0x10   : > { %s1423_s21 = scalar_lea.vmem %s1517_s0, %s1131_s18  ;;  %s1132_s22 = sshll.u32 %s362_s17, 1  ;;  %371 = vst.msk [vmem:[#allocation2] sm:$0x3] (!%p1133_p5), %vm370_vm0, %v1337_v0  ;;  %372 = vst.msk [vmem:[#allocation3] sm:$0x3] (!%p1133_p5), %vm370_vm0, %v1337_v0 }
  0x11   : > { %s1428_s25 = scalar_lea.vmem %s1518_s1, %s1132_s22 }
  0x16 PF: > { %v375_v1 = vld [vmem:[%s1519_s2] sm:$0xff]  ;;  %v376_v2 = vld [vmem:[%s1519_s2 + $0x8] sm:$0xff]  ;;  %v1338_v3 = vmov 0.0|0.0   ;;  %vm1339_vm1 = vmmov 0   ;;  %v1340_v5 = vmov 0.0   ;;  %vm384_vm2 = vcmask 130048  }
  0x17   : > { %1212 = vmatprep.subr.bf16.mxu0 %v1338_v3  ;;  %v1213_v4 = vpack.c.bf16 %v376_v2, %v375_v1  ;;  %1174 = vmatprep.mubr.msk.f32.mxu0 %vm1339_vm1, %v1340_v5  ;;  %v488_v6 = vld [vmem:[%s1520_s3] sm:$0xff]  ;;  %v489_v7 = vld [vmem:[%s1520_s3 + $0x8] sm:$0xff]  ;;  %s1341_s22 = smov 96   ;;  %s1342_s23 = smov 32   ;;  %vm602_vm3 = vcmask 123904  }
  0x18   : > { %1215 = vmatprep.subr.bf16.mxu1 %v1338_v3  ;;  %v1216_v8 = vpack.c.bf16 %v489_v7, %v488_v6  ;;  %1181 = vmatprep.mubr.msk.f32.mxu1 %vm1339_vm1, %v1340_v5  ;;  %v374_v9 = vld [vmem:[#allocation2] sm:$0x3]  ;;  %v487_v10 = vld [vmem:[#allocation3] sm:$0x3]  ;;  %s1344_s24 = smov 112   ;;  %s1139_s26 = sshll.u32 %s1415_s15, 1 }
  0x19   : > { %1214 = vmatpush3.bf16.msra.mxu0 %v1213_v4  ;;  %v1134_v11 = vld [vmem:[%s1521_s4] ss:$0 sm:$0xff]  ;;  %s614_s28 = scalar_lea.vmem [#allocation5], %s1139_s26  ;;  %p1140_p6 = scmp.ne.s32.totalorder %s1409_s14, 7 }
  0x1a   : > { %1217 = vmatpush3.bf16.msra.mxu1 %v1216_v8  ;;  %v1136_v13 = vld [vmem:[%s1522_s5] ss:$0 sm:$0xff]  ;;  %v661_v58 = vld [vmem:[%s1523_s6 + $0x8] sm:$0xff] (!%p1140_p6)  ;;  %v1345_v59 = vmov (!%p1140_p6), 0.0|0.0   ;;  %vm1346_vm4 = vmmov (!%p1140_p6), 0   ;;  %v1347_v61 = vmov (!%p1140_p6), 0.0  }
  0x1b   : > { %v373_v19 = vld [vmem:[%s1423_s21] sm:$0x3]  ;;  %s1343_s21 = smov 16   ;;  %1218 = vmatprep.subr.bf16.mxu0 (!%p1140_p6), %v1345_v59  ;;  %1221 = vmatprep.subr.bf16.mxu1 (!%p1140_p6), %v1345_v59  ;;  %v771_v8 = vld [vmem:[%s1525_s8 + $0x8] sm:$0xff] (!%p1140_p6)  ;;  %vm678_vm5 = vcmask (!%p1140_p6), 1041409   ;;  %vm681_vm6 = vcmask (!%p1140_p6), 1042434  }
  0x1c   : > { %1175 = vmatmul.mubr.msk.f32.vlgmr.msra.gmra.mrb[0].mxu0 %vm384_vm2, %v374_v9  ;;  %v486_v21 = vld [vmem:[%s1428_s25] sm:$0x3]  ;;  %s1138_s25 = sshll.u32 %s1409_s14, 1  ;;  %vm684_vm7 = vcmask (!%p1140_p6), 1043459   ;;  %vm687_vm8 = vcmask (!%p1140_p6), 1044484   ;;  %vm690_vm9 = vcmask (!%p1140_p6), 1045509  }
  0x1d   : > { %1182 = vmatmul.mubr.msk.f32.vlgmr.msra.gmra.mrb[0].mxu1 %vm384_vm2, %v487_v10  ;;  %s610_s27 = scalar_lea.vmem [#allocation4], %s1138_s25  ;;  %v660_v57 = vld [vmem:[%s1523_s6] sm:$0xff] (!%p1140_p6)  ;;  %1188 = vmatprep.mubr.msk.f32.mxu0 (!%p1140_p6), %vm1346_vm4, %v1347_v61  ;;  %vm693_vm10 = vcmask (!%p1140_p6), 1046534   ;;  %vm696_vm11 = vcmask (!%p1140_p6), 1047559   ;;  %vm853_vm12 = vcmask (!%p1140_p6), 23552  }
  0x1e   : > { %v1462_v60 = vpack.c.bf16 (!%p1140_p6), %v661_v58, %v660_v57  ;;  %1195 = vmatprep.mubr.msk.f32.mxu1 (!%p1140_p6), %vm1346_vm4, %v1347_v61  ;;  %v770_v6 = vld [vmem:[%s1525_s8] sm:$0xff] (!%p1140_p6) }
  0x20   : > { %1220 = vmatpush3.bf16.msra.mxu0 (!%p1140_p6), %v1462_v60 }
  0x21   : > { %1224 = vmatprep.subr.bf16.mxu0 (!%p1140_p6), %v1345_v59 }
  0xef   : > { %v454_v12 = vpop.f32.mrb[0].mxu0 }
  0xf0   : > { %v455_v14 = vadd.f32 %v1134_v11, %v454_v12  ;;  %v1176_v15 = vpop.f32.mrb[1].mxu0  ;;  %v566_v16 = vpop.f32.mrb[0].mxu1 }
  0xf1   : > { %v1183_v17 = vpop.f32.mrb[1].mxu1  ;;  %v567_v18 = vadd.f32 %v1136_v13, %v566_v16 }
  0xf2   : > { %465 = vrot.lane.b32.xlu0 %v455_v14, %s1341_s22  ;;  %v458_v20 = vadd.f32 %v455_v14, %v373_v19 }
  0xf3   : > { %v570_v23 = vadd.f32 %v567_v18, %v486_v21 }
  0xf4   : > { %v459_v22 = vsub.f32 0.0, %v458_v20 }
  0xf5   : > { %v571_v25 = vsub.f32 0.0, %v570_v23 }
  0xf6   : > { %577 = vrot.lane.b32.xlu0 %v567_v18, %s1341_s22  ;;  %v460_v24 = vmul.f32 1.442695, %v459_v22 }
  0xf7   : > { %v572_v26 = vmul.f32 1.442695, %v571_v25 }
  0xf8   : > { %1249 = vpow2.f32 %v460_v24 }
  0xf9   : > { %1251 = vpow2.f32 %v572_v26 }
 0x102   : > { %v1250_v27 = vpop.eup %1249 }
 0x103   : > { %v462_v28 = vadd.f32 1.0, %v1250_v27  ;;  %v1252_v29 = vpop.eup %1251 }
 0x104   : > { %v574_v30 = vadd.f32 1.0, %v1252_v29 }
 0x105   : > { %1253 = vrcp.f32 %v462_v28 }
 0x106   : > { %1255 = vrcp.f32 %v574_v30 }
 0x10f   : > { %v1254_v31 = vpop.eup %1253 }
 0x110   : > { %v1256_v34 = vpop.eup %1255  ;;  %v475_v44 = vsub.f32 1.0, %v1254_v31 }
 0x111   : > { %v587_v50 = vsub.f32 1.0, %v1256_v34 }
 0x164   : > { %v466_v32 = vpop.permute.xlu0 %465 }
 0x165   : > { %v468_v33 = vmul.f32 %v1254_v31, %v466_v32 }
 0x167   : > { %470 = vrot.lane.b32.xlu1 %v468_v33, %s1342_s23 }
 0x168   : > { %v578_v35 = vpop.permute.xlu0 %577 }
 0x169   : > { %v580_v36 = vmul.f32 %v1256_v34, %v578_v35 }
 0x16b   : > { %582 = vrot.lane.b32.xlu1 %v580_v36, %s1342_s23 }
 0x16f   : > { %481 = vrot.lane.b32.xlu1 %v374_v9, %s1343_s21 }
 0x173   : > { %593 = vrot.lane.b32.xlu1 %v487_v10, %s1343_s21  ;;  %v1475_v10 = vpack.c.bf16 (!%p1140_p6), %v771_v8, %v770_v6 }
 0x175   : > { %1223 = vmatpush3.bf16.msra.mxu1 (!%p1140_p6), %v1475_v10 }
 0x176   : > { %1227 = vmatprep.subr.bf16.mxu1 (!%p1140_p6), %v1345_v59 }
 0x1d9   : > { %v471_v37 = vpop.permute.xlu1 %470 }
 0x1da   : > { %v473_v38 = vadd.f32 %v471_v37, %v373_v19 }
 0x1dc   : > { %1257 = vtanh.f32 %v473_v38 }
 0x1dd   : > { %v583_v39 = vpop.permute.xlu1 %582 }
 0x1de   : > { %v585_v40 = vadd.f32 %v583_v39, %v486_v21 }
 0x1e0   : > { %1259 = vtanh.f32 %v585_v40 }
 0x1e1   : > { %v482_v43 = vpop.permute.xlu1 %481 }
 0x1e2   : > { %v484_v46 = vmul.f32 %v1254_v31, %v482_v43 }
 0x1e5   : > { %v594_v48 = vpop.permute.xlu1 %593 }
 0x1e6   : > { %v1258_v41 = vpop.eup %1257  ;;  %v596_v52 = vmul.f32 %v1256_v34, %v594_v48 }
 0x1e7   : > { %477 = vrot.lane.b32.xlu0 %v1258_v41, %s1344_s24 }
 0x1ea   : > { %v1260_v42 = vpop.eup %1259 }
 0x1eb   : > { %589 = vrot.lane.b32.xlu0 %v1260_v42, %s1344_s24 }
 0x259   : > { %v478_v45 = vpop.permute.xlu0 %477 }
 0x25a   : > { %v480_v47 = vmul.f32 %v478_v45, %v475_v44 }
 0x25c   : > { %v485_v49 = vadd.f32 %v484_v46, %v480_v47 }
 0x25d   : > { %v590_v51 = vpop.permute.xlu0 %589 }
 0x25e   : > { %v592_v53 = vmul.f32 %v590_v51, %v587_v50  ;;  %599 = vrot.lane.b32.xlu0 %v485_v49, %s1344_s24 }
 0x260   : > { %v597_v54 = vadd.f32 %v596_v52, %v592_v53 }
 0x262   : > { %605 = vrot.lane.b32.xlu1 %v597_v54, %s1344_s24 }
 0x2cf   : > { %619 = sbr.rel (%p1140_p6) target bundleno = 1220 (0x4c4), region = 68 }
 0x2d0   : > { %v600_v55 = vpop.permute.xlu0 %599 }
 0x2d1   : > { %603 = vst.msk [vmem:[#allocation2] sm:$0x3] %vm602_vm3, %v600_v55  ;;  %611 = vst.msk [vmem:[%s610_s27] sm:$0x3] %vm602_vm3, %v600_v55 }
 0x2d4   : > { %v606_v56 = vpop.permute.xlu1 %605 }
 0x2d5   : > { %608 = vst.msk [vmem:[#allocation3] sm:$0x3] %vm602_vm3, %v606_v56  ;;  %615 = vst.msk [vmem:[%s614_s28] sm:$0x3] %vm602_vm3, %v606_v56 }
 0x2d8   : > { %v636_v7 = vld [vmem:[#allocation4] sm:$0x1]  ;;  %v637_v9 = vld [vmem:[#allocation4 + $0x2] sm:$0x1]  ;;  %v638_v11 = vld [vmem:[#allocation4 + $0x4] sm:$0x1] }
 0x2d9   : > { %v639_v12 = vld [vmem:[#allocation4 + $0x6] sm:$0x1]  ;;  %v640_v13 = vld [vmem:[#allocation4 + $0x8] sm:$0x1]  ;;  %v641_v15 = vld [vmem:[#allocation4 + $0xa] sm:$0x1] }
 0x2da   : > { %v642_v17 = vld [vmem:[#allocation4 + $0xc] sm:$0x1]  ;;  %v643_v19 = vld [vmem:[#allocation4 + $0xe] sm:$0x1]  ;;  %v871_v40 = vld [vmem:[#allocation4 + $0x1] sm:$0x1] }
 0x2db   : > { %v872_v44 = vld [vmem:[#allocation4 + $0x3] sm:$0x1]  ;;  %v873_v48 = vld [vmem:[#allocation4 + $0x5] sm:$0x1]  ;;  %v874_v53 = vld [vmem:[#allocation4 + $0x7] sm:$0x1] }
 0x2dc   : > { %v620_v62 = vld [vmem:[#allocation5] sm:$0x1]  ;;  %v621_v63 = vld [vmem:[#allocation5 + $0x2] sm:$0x1]  ;;  %v622_v0 = vld [vmem:[#allocation5 + $0x4] sm:$0x1] }
 0x2dd   : > { %v623_v1 = vld [vmem:[#allocation5 + $0x6] sm:$0x1]  ;;  %1261 = vtanh.f32 %v620_v62  ;;  %v624_v2 = vld [vmem:[#allocation5 + $0x8] sm:$0x1]  ;;  %v625_v3 = vld [vmem:[#allocation5 + $0xa] sm:$0x1] }
 0x2de   : > { %1263 = vtanh.f32 %v621_v63  ;;  %v626_v4 = vld [vmem:[#allocation5 + $0xc] sm:$0x1]  ;;  %v627_v5 = vld [vmem:[#allocation5 + $0xe] sm:$0x1]  ;;  %v855_v21 = vld [vmem:[#allocation5 + $0x1] sm:$0x1] }
 0x2df   : > { %1265 = vtanh.f32 %v622_v0  ;;  %v856_v23 = vld [vmem:[#allocation5 + $0x3] sm:$0x1]  ;;  %v857_v25 = vld [vmem:[#allocation5 + $0x5] sm:$0x1]  ;;  %v858_v27 = vld [vmem:[#allocation5 + $0x7] sm:$0x1] }
 0x2e0   : > { %1267 = vtanh.f32 %v623_v1  ;;  %v859_v29 = vld [vmem:[#allocation5 + $0x9] sm:$0x1]  ;;  %v860_v31 = vld [vmem:[#allocation5 + $0xb] sm:$0x1]  ;;  %v861_v33 = vld [vmem:[#allocation5 + $0xd] sm:$0x1] }
 0x2e1   : > { %1269 = vtanh.f32 %v624_v2  ;;  %v862_v37 = vld [vmem:[#allocation5 + $0xf] sm:$0x1]  ;;  %v875_v58 = vld [vmem:[#allocation4 + $0x9] sm:$0x1]  ;;  %v876_v1 = vld [vmem:[#allocation4 + $0xb] sm:$0x1] }
 0x2e2   : > { %1271 = vtanh.f32 %v625_v3 }
 0x2e3   : > { %1273 = vtanh.f32 %v626_v4 }
 0x2e4   : > { %1275 = vtanh.f32 %v627_v5  ;;  %v877_v5 = vld [vmem:[#allocation4 + $0xd] sm:$0x1] }
 0x2e5   : > { %1277 = vtanh.f32 %v636_v7 }
 0x2e6   : > { %1279 = vtanh.f32 %v637_v9  ;;  %v878_v9 = vld [vmem:[#allocation4 + $0xf] sm:$0x1] }
 0x2e7   : > { %v1262_v14 = vpop.eup %1261  ;;  %1281 = vtanh.f32 %v638_v11 }
 0x2e8   : > { %v1264_v16 = vpop.eup %1263  ;;  %1283 = vtanh.f32 %v639_v12 }
 0x2e9   : > { %v1266_v18 = vpop.eup %1265  ;;  %1285 = vtanh.f32 %v640_v13 }
 0x2ea   : > { %v1268_v20 = vpop.eup %1267  ;;  %1287 = vtanh.f32 %v641_v15 }
 0x2eb   : > { %v1270_v22 = vpop.eup %1269  ;;  %1289 = vtanh.f32 %v642_v17 }
 0x2ec   : > { %v1272_v24 = vpop.eup %1271  ;;  %1291 = vtanh.f32 %v643_v19 }
 0x2ed   : > { %v1274_v26 = vpop.eup %1273  ;;  %1293 = vtanh.f32 %v855_v21 }
 0x2ee   : > { %v1276_v28 = vpop.eup %1275  ;;  %1295 = vtanh.f32 %v856_v23 }
 0x2ef   : > { %v1278_v30 = vpop.eup %1277  ;;  %1297 = vtanh.f32 %v857_v25 }
 0x2f0   : > { %v1280_v32 = vpop.eup %1279  ;;  %1299 = vtanh.f32 %v858_v27  ;;  %v652_v35 = vmul.f32 %v1278_v30, %v1262_v14 }
 0x2f1   : > { %v1282_v34 = vpop.eup %1281  ;;  %v653_v36 = vmul.f32 %v1280_v32, %v1264_v16  ;;  %1301 = vtanh.f32 %v859_v29 }
 0x2f2   : > { %v1284_v38 = vpop.eup %1283  ;;  %v654_v39 = vmul.f32 %v1282_v34, %v1266_v18  ;;  %1303 = vtanh.f32 %v860_v31 }
 0x2f3   : > { %v1286_v41 = vpop.eup %1285  ;;  %v655_v42 = vmul.f32 %v1284_v38, %v1268_v20  ;;  %v677_v43 = vrot.slane %v653_v36, 7  ;;  %1305 = vtanh.f32 %v861_v33 }
 0x2f4   : > { %v1288_v45 = vpop.eup %1287  ;;  %v656_v46 = vmul.f32 %v1286_v41, %v1270_v22  ;;  %v680_v47 = vrot.slane %v654_v39, 6  ;;  %1307 = vtanh.f32 %v862_v37 }
 0x2f5   : > { %v1290_v49 = vpop.eup %1289  ;;  %v657_v50 = vmul.f32 %v1288_v45, %v1272_v24  ;;  %v679_v51 = vsel %vm678_vm5, %v677_v43, %v652_v35  ;;  %v683_v52 = vrot.slane %v655_v42, 5  ;;  %1309 = vtanh.f32 %v871_v40 }
 0x2f6   : > { %v1292_v54 = vpop.eup %1291  ;;  %v658_v55 = vmul.f32 %v1290_v49, %v1274_v26  ;;  %v682_v56 = vsel %vm681_vm6, %v680_v47, %v679_v51  ;;  %v686_v57 = vrot.slane %v656_v46, 4  ;;  %1311 = vtanh.f32 %v872_v44  ;;  %v1141_v47 = vld [vmem:[%s1524_s7] ss:$0 sm:$0xff] }
 0x2f7   : > { %v1294_v59 = vpop.eup %1293  ;;  %v659_v62 = vmul.f32 %v1292_v54, %v1276_v28  ;;  %v685_v63 = vsel %vm684_vm7, %v683_v52, %v682_v56  ;;  %v689_v0 = vrot.slane %v657_v50, 3  ;;  %1313 = vtanh.f32 %v873_v48  ;;  %v1143_v54 = vld [vmem:[%s1526_s9] ss:$0 sm:$0xff] }
 0x2f8   : > { %v1296_v2 = vpop.eup %1295  ;;  %v688_v3 = vsel %vm687_vm8, %v686_v57, %v685_v63  ;;  %v692_v4 = vrot.slane %v658_v55, 2  ;;  %1315 = vtanh.f32 %v874_v53 }
 0x2f9   : > { %v1298_v6 = vpop.eup %1297  ;;  %v691_v7 = vsel %vm690_vm9, %v689_v0, %v688_v3  ;;  %v695_v8 = vrot.slane %v659_v62, 1  ;;  %1317 = vtanh.f32 %v875_v58 }
 0x2fa   : > { %v1300_v11 = vpop.eup %1299  ;;  %v694_v12 = vsel %vm693_vm10, %v692_v4, %v691_v7  ;;  %1319 = vtanh.f32 %v876_v1 }
 0x2fb   : > { %v1302_v13 = vpop.eup %1301  ;;  %v697_v14 = vsel %vm696_vm11, %v695_v8, %v694_v12  ;;  %1321 = vtanh.f32 %v877_v5 }
 0x2fc   : > { %v1304_v15 = vpop.eup %1303  ;;  %1189 = vmatmul.mubr.msk.f32.vlgmr.msra.gmra.mrb[0].mxu0 %vm384_vm2, %v697_v14  ;;  %1323 = vtanh.f32 %v878_v9 }
 0x2fd   : > { %v1306_v16 = vpop.eup %1305  ;;  %1226 = vmatpush3.bf16.msra.mxu0 %v1462_v60  ;;  %1202 = vmatprep.mubr.msk.f32.mxu0 %vm1346_vm4, %v1347_v61 }
 0x2fe   : > { %v1308_v17 = vpop.eup %1307 }
 0x2ff   : > { %v1310_v18 = vpop.eup %1309 }
 0x300   : > { %v1312_v19 = vpop.eup %1311  ;;  %v887_v21 = vmul.f32 %v1310_v18, %v1294_v59 }
 0x301   : > { %v1314_v20 = vpop.eup %1313  ;;  %v888_v22 = vmul.f32 %v1312_v19, %v1296_v2 }
 0x302   : > { %v1316_v23 = vpop.eup %1315  ;;  %v889_v24 = vmul.f32 %v1314_v20, %v1298_v6 }
 0x303   : > { %v1318_v25 = vpop.eup %1317  ;;  %v890_v26 = vmul.f32 %v1316_v23, %v1300_v11  ;;  %v912_v27 = vrot.slane %v888_v22, 7 }
 0x304   : > { %v1320_v28 = vpop.eup %1319  ;;  %v891_v29 = vmul.f32 %v1318_v25, %v1302_v13  ;;  %v914_v30 = vrot.slane %v889_v24, 6 }
 0x305   : > { %v1322_v31 = vpop.eup %1321  ;;  %v892_v32 = vmul.f32 %v1320_v28, %v1304_v15  ;;  %v913_v60 = vsel %vm678_vm5, %v912_v27, %v887_v21  ;;  %v916_v33 = vrot.slane %v890_v26, 5 }
 0x306   : > { %v1324_v34 = vpop.eup %1323  ;;  %v893_v35 = vmul.f32 %v1322_v31, %v1306_v16  ;;  %v915_v36 = vsel %vm681_vm6, %v914_v30, %v913_v60  ;;  %v918_v37 = vrot.slane %v891_v29, 4 }
 0x307   : > { %v894_v38 = vmul.f32 %v1324_v34, %v1308_v17  ;;  %v917_v39 = vsel %vm684_vm7, %v916_v33, %v915_v36  ;;  %v920_v40 = vrot.slane %v892_v32, 3 }
 0x308   : > { %v919_v41 = vsel %vm687_vm8, %v918_v37, %v917_v39  ;;  %v922_v42 = vrot.slane %v893_v35, 2 }
 0x309   : > { %v921_v43 = vsel %vm690_vm9, %v920_v40, %v919_v41  ;;  %v924_v44 = vrot.slane %v894_v38, 1 }
 0x30a   : > { %v923_v45 = vsel %vm693_vm10, %v922_v42, %v921_v43 }
 0x30b   : > { %v925_v46 = vsel %vm696_vm11, %v924_v44, %v923_v45 }
 0x30c   : > { %1203 = vmatmul.mubr.msk.f32.vlgmr.msra.gmra.mrb[2].mxu0 %vm384_vm2, %v925_v46 }
 0x3cf   : > { %v766_v48 = vpop.f32.mrb[0].mxu0 }
 0x3d0   : > { %v767_v49 = vadd.f32 %v1141_v47, %v766_v48  ;;  %v1190_v50 = vpop.f32.mrb[1].mxu0 }
 0x3d2   : > { %1196 = vmatmul.mubr.msk.f32.vlgmr.msra.gmra.mrb[0].mxu1 %vm384_vm2, %v767_v49 }
 0x3d3   : > { %1229 = vmatpush3.bf16.msra.mxu1 %v1475_v10  ;;  %1209 = vmatprep.mubr.msk.f32.mxu1 %vm1346_vm4, %v1347_v61 }
 0x3df   : > { %v994_v51 = vpop.f32.mrb[2].mxu0 }
 0x3e0   : > { %v995_v52 = vadd.f32 %v1141_v47, %v994_v51  ;;  %v1204_v53 = vpop.f32.mrb[3].mxu0 }
 0x3e2   : > { %1210 = vmatmul.mubr.msk.f32.vlgmr.msra.gmra.mrb[2].mxu1 %vm384_vm2, %v995_v52 }
 0x4a5   : > { %v848_v55 = vpop.f32.mrb[0].mxu1 }
 0x4a6   : > { %v849_v56 = vadd.f32 %v1143_v54, %v848_v55  ;;  %v1197_v57 = vpop.f32.mrb[1].mxu1 }
 0x4a8   : > { %1325 = vtanh.f32 %v849_v56 }
 0x4b2   : > { %v1326_v58 = vpop.eup %1325 }
 0x4b3   : > { %854 = vst.msk [vmem:[%s1527_s10] sm:$0xff] %vm853_vm12, %v1326_v58 }
 0x4b5   : > { %v1076_v61 = vpop.f32.mrb[2].mxu1 }
 0x4b6   : > { %v1077_v10 = vadd.f32 %v1143_v54, %v1076_v61  ;;  %v1211_v59 = vpop.f32.mrb[3].mxu1 }
 0x4b8   : > { %1327 = vtanh.f32 %v1077_v10 }
 0x4c2   : > { %v1328_v62 = vpop.eup %1327 }
 0x4c3   : > { %1149 = vst.msk [vmem:[%s1527_s10 + $0x8] sm:$0xff] %vm853_vm12, %v1328_v62 }
 0x4c4 PF: > { %s20_s13 = sadd.s32 1, %s1335_s13  }
 0x4c5   : > { %p17_p7 = scmp.ge.s32.totalorder %s20_s13, 10  }
 0x4c7   :  { %19 = sbr.rel (!%p17_p7) target bundleno = 1 (0x1), region = 100 }

</bundles_post_ra>
